<compile_context>
chip_gen: v6e
topology: v6e:2x2x1
jax: 0.10.0
libtpu: 0.0.40
codegen_flags: <defaults>
</compile_context>

<pallas_src>
import functools

import jax
import jax.numpy as jnp
import numpy as np
from jax import lax
from jax.experimental import pallas as pl
from jax.experimental.pallas import tpu as pltpu

BN_EPS = 1e-5
AGG_EPS = 1e-6


def _round_up(x, m):
    return ((x + m - 1) // m) * m


def gated_gcn_kernel(h_ref, e_ref, st_ref, wh_ref, bh_ref, wc_ref, bc_ref,
                     h_out_ref, e_out_ref,
                     hab_sc, de_sc, ssig_sc, ssh_sc, esum_sc, esq_sc, eee_sc,
                     enew_sc,
                     *, num_edges, num_nodes, edge_block, stash_edges):
    f32 = jnp.float32
    phase = pl.program_id(0)
    blk = pl.program_id(1)
    nblk = pl.num_programs(1)
    np_, dp = h_ref.shape                       # padded node / feature dims

    # ---- one-time (first grid step): fused h-side linears + accumulator init ----
    @pl.when(jnp.logical_and(phase == 0, blk == 0))
    def _init():
        hlin = jnp.dot(h_ref[...], wh_ref[...],
                       preferred_element_type=f32) + bh_ref[...]   # (Np, 4dp) = [Ah|Bh|Dh|Eh]
        hab_sc[...] = hlin[:, :2 * dp]                              # [Ah | Bh]
        de_sc[:np_, :] = hlin[:, 2 * dp:3 * dp]                     # Dh
        de_sc[np_:, :] = hlin[:, 3 * dp:]                           # Eh
        ssig_sc[...] = jnp.zeros_like(ssig_sc)
        ssh_sc[...] = jnp.zeros_like(ssh_sc)
        esum_sc[...] = jnp.zeros_like(esum_sc)
        esq_sc[...] = jnp.zeros_like(esq_sc)

    st = st_ref[...].astype(f32)                # bf16 one-hot [S | T] -> f32 (exact)
    t_blk = st[:, np_:]                         # (eblk, Np) dst one-hot
    dn = (((0,), (0,)), ((), ()))               # contract edge axis: T^T @ x
    e_start = pl.multiple_of(blk * edge_block, edge_block)

    @pl.when(phase == 0)
    def _accumulate():
        ce = jnp.dot(e_ref[...], wc_ref[...], preferred_element_type=f32) + bc_ref[...]
        e_new = jnp.dot(st, de_sc[...], preferred_element_type=f32) + ce  # S@Dh + T@Eh + Ce
        sigma = jax.nn.sigmoid(e_new)
        if stash_edges:
            enew_sc[pl.ds(e_start, edge_block), :] = e_new
        ssig_sc[...] += lax.dot_general(t_blk, sigma, dimension_numbers=dn,
                                        preferred_element_type=f32)
        esum_sc[...] += jnp.sum(e_new, axis=0, keepdims=True)
        esq_sc[...] += jnp.sum(e_new * e_new, axis=0, keepdims=True)
        # No e_out write here: the e_out block index is constant during phase 0,
        # so nothing is flushed to HBM until phase 1 fills it with real data.

    @pl.when(phase == 1)
    def _finalize():
        @pl.when(blk == 0)
        def _():
            # eee = Bh / (sum_sigma + eps); sum_sigma complete after phase 0.
            eee_sc[...] = hab_sc[:, dp:] * pl.reciprocal(ssig_sc[...] + AGG_EPS)

        if stash_edges:
            e_new = enew_sc[pl.ds(e_start, edge_block), :]
        else:
            ce = jnp.dot(e_ref[...], wc_ref[...], preferred_element_type=f32) + bc_ref[...]
            e_new = jnp.dot(st, de_sc[...], preferred_element_type=f32) + ce
        sigma = jax.nn.sigmoid(e_new)           # cheap EUP recompute from the stash

        s_blk = st[:, :np_]
        m = jnp.dot(s_blk, eee_sc[...], preferred_element_type=f32) * sigma
        ssh_sc[...] += lax.dot_general(t_blk, m, dimension_numbers=dn,
                                       preferred_element_type=f32)

        # Edge output: training-mode BatchNorm1d (batch stats, gamma=1, beta=0),
        # ReLU, residual.  Dropout p=0.0 -> identity.
        inv_e = 1.0 / num_edges
        mu_e = esum_sc[...] * inv_e
        var_e = jnp.maximum(esq_sc[...] * inv_e - mu_e * mu_e, 0.0)
        e_bn = (e_new - mu_e) * lax.rsqrt(var_e + BN_EPS)
        e_out_ref[...] = e_ref[...] + jnp.maximum(e_bn, 0.0)

        @pl.when(blk == nblk - 1)
        def _():
            h_new = hab_sc[:, :dp] + ssh_sc[...]                    # Ah + sum_sigma_h
            # Mask out padded node rows for the BatchNorm statistics.
            row = lax.broadcasted_iota(jnp.int32, (np_, 1), 0)
            valid = row < num_nodes
            inv_n = 1.0 / num_nodes
            mu_h = jnp.sum(jnp.where(valid, h_new, 0.0), axis=0, keepdims=True) * inv_n
            cen = jnp.where(valid, h_new - mu_h, 0.0)
            var_h = jnp.sum(cen * cen, axis=0, keepdims=True) * inv_n
            h_bn = (h_new - mu_h) * lax.rsqrt(var_h + BN_EPS)
            h_out_ref[...] = h_ref[...] + jnp.maximum(h_bn, 0.0)


def gated_test_layer(h, e, S, T, params, *, edge_block=None):
    """Forward of GatedTestLayer (sum aggregator, BN train mode, residual, dropout=0)."""
    n, d = h.shape
    n_edges = e.shape[0]
    d_out = params["wa"].shape[1]
    assert d == d_out, "residual path requires input_dim == output_dim"

    dp = _round_up(d, 128)                    # lane-dense feature dim
    np_ = _round_up(n, 128)                   # lane-aligned node dim (one-hot zero padding)

    # ---- per-generation VMEM budget (never request all of physical VMEM) ----
    try:
        vmem_cap = int(pltpu.get_tpu_info().vmem_capacity_bytes)
    except Exception:
        vmem_cap = 64 * 1024 * 1024
    vmem_budget = int(min(vmem_cap - 8 * 1024 * 1024, (vmem_cap * 7) // 8,
                          112 * 1024 * 1024))

    # Resident scratch + resident blocks (bytes, f32 unless noted).
    fixed_bytes = 4 * (np_ * 2 * dp            # [Ah|Bh]
                       + 2 * np_ * dp          # [Dh;Eh]
                       + 3 * np_ * dp          # ssig, ssh, eee
                       + 2 * 8 * dp)           # e-BN stats (padded)
    fixed_bytes += 2 * 2 * 4 * np_ * dp        # h / h_out blocks (conservative 2 bufs)
    fixed_bytes += 2 * 4 * (dp * 4 * dp + dp * dp + 5 * dp)   # weights / biases

    # Streamed bytes per edge row (double-buffered tiles): bf16 ST + f32 e + e_out.
    per_edge = 2 * (2 * np_) * 2 + 2 * dp * 4 + 2 * dp * 4

    # Stash e_new across phases when it fits: skips re-running ST@[Dh;Eh] and Ce.
    stash_bytes = 4 * n_edges * dp
    stash_edges = fixed_bytes + stash_bytes + 16 * per_edge <= vmem_budget
    eff_fixed = fixed_bytes + (stash_bytes if stash_edges else 4 * 16 * dp)

    if edge_block is None:
        cap = max(16, (vmem_budget - eff_fixed) // per_edge)
        cap = int(min(cap, n_edges, 2048))
        if cap >= n_edges:
            edge_block = n_edges
        else:
            blk = (cap // 16) * 16
            while blk > 16 and n_edges % blk != 0:
                blk -= 16
            edge_block = max(blk, 16)
    assert n_edges % edge_block == 0
    # bf16 ST tiles pack 16 rows per sublane tile -> keep edge tiles 16-aligned.
    assert edge_block == n_edges or edge_block % 16 == 0
    nblk = n_edges // edge_block

    def pad_w(w):
        return jnp.zeros((dp, dp), jnp.float32).at[:d, :d_out].set(w)

    def pad_b(b):
        return jnp.zeros((1, dp), jnp.float32).at[:, :d_out].set(jnp.reshape(b, (1, -1)))

    # Fused h-side weights [A | B | D | E] -> one (dp, 4*dp) matmul in-kernel.
    wh = jnp.concatenate([pad_w(params["wa"]), pad_w(params["wb"]),
                          pad_w(params["wd"]), pad_w(params["we"])], axis=1)
    bh = jnp.concatenate([pad_b(params["ba"]), pad_b(params["bb"]),
                          pad_b(params["bd"]), pad_b(params["be"])], axis=1)
    wc = pad_w(params["wc"])
    bc = pad_b(params["bc"])

    h_p = jnp.zeros((np_, dp), jnp.float32).at[:n, :d].set(h)
    e_p = jnp.zeros((n_edges, dp), jnp.float32).at[:, :d].set(e)
    s_p = jnp.zeros((n_edges, np_), jnp.float32).at[:, :n].set(S)
    t_p = jnp.zeros((n_edges, np_), jnp.float32).at[:, :n].set(T)
    st = jnp.concatenate([s_p, t_p], axis=1).astype(jnp.bfloat16)  # 0/1 -> bf16 is exact

    # TODO(synk): for large sparse graphs replace the dense one-hot ST matmuls with
    # index-based gathers/scatters (PrefetchScalarGridSpec + int32 src/dst arrays).
    # TODO(synk): on v7x, give each TensorCore its own partial ssig/ssh/esum/esq
    # accumulators so the edge axis can be marked "parallel" (dual-TC).

    mm_edge = 2 * n_edges * (2 * np_) * dp + 2 * n_edges * dp * dp   # ST@[Dh;Eh] + Ce
    flops = int(2 * np_ * dp * 4 * dp                                # fused node linears
                + mm_edge * (1 if stash_edges else 2)                # phase-0 (+phase-1 if recompute)
                + 2 * (2 * n_edges * np_ * dp)                       # two T^T scatter-reductions
                + 2 * n_edges * np_ * dp)                            # S @ eee gather
    bytes_accessed = int(
        4 * (np_ * dp                                                # h (resident)
             + np_ * dp                                              # h_out
             + n_edges * dp                                          # e_out (written once)
             + 2 * n_edges * dp                                      # e streamed both phases
             + dp * 4 * dp + dp * dp + 5 * dp)                       # weights / biases
        + 2 * (2 * n_edges * 2 * np_))                               # bf16 ST, both phases

    kernel = functools.partial(gated_gcn_kernel,
                               num_edges=float(n_edges), num_nodes=n,
                               edge_block=edge_block, stash_edges=stash_edges)

    h_out_p, e_out_p = pl.pallas_call(
        kernel,
        out_shape=(jax.ShapeDtypeStruct((np_, dp), jnp.float32),
                   jax.ShapeDtypeStruct((n_edges, dp), jnp.float32)),
        grid=(2, nblk),                                              # (phase, edge tile)
        in_specs=[
            pl.BlockSpec((np_, dp), lambda p, k: (0, 0)),            # h (resident)
            pl.BlockSpec((edge_block, dp), lambda p, k: (k, 0)),     # e tile
            pl.BlockSpec((edge_block, 2 * np_), lambda p, k: (k, 0)),  # [S|T] tile (bf16)
            pl.BlockSpec((dp, 4 * dp), lambda p, k: (0, 0)),         # fused W_h
            pl.BlockSpec((1, 4 * dp), lambda p, k: (0, 0)),          # fused b_h
            pl.BlockSpec((dp, dp), lambda p, k: (0, 0)),             # W_C
            pl.BlockSpec((1, dp), lambda p, k: (0, 0)),              # b_C
        ],
        out_specs=(
            pl.BlockSpec((np_, dp), lambda p, k: (0, 0)),            # h_out (resident)
            # Block index constant during phase 0 (no throwaway writeback);
            # phase 1 visits & writes every edge tile exactly once.
            pl.BlockSpec((edge_block, dp), lambda p, k: (p * k, 0)),
        ),
        scratch_shapes=[
            pltpu.VMEM((np_, 2 * dp), jnp.float32),   # [Ah | Bh]
            pltpu.VMEM((2 * np_, dp), jnp.float32),   # [Dh ; Eh]
            pltpu.VMEM((np_, dp), jnp.float32),       # sum_sigma accumulator
            pltpu.VMEM((np_, dp), jnp.float32),       # sum_sigma_h accumulator
            pltpu.VMEM((1, dp), jnp.float32),         # sum(e_new)   (e-BN stats)
            pltpu.VMEM((1, dp), jnp.float32),         # sum(e_new^2) (e-BN stats)
            pltpu.VMEM((np_, dp), jnp.float32),       # eee = Bh / (sum_sigma + eps)
            pltpu.VMEM((n_edges if stash_edges else 16, dp), jnp.float32),  # e_new stash
        ],
        compiler_params=pltpu.CompilerParams(
            # Both axes carry cross-step scratch accumulation -> sequential.
            dimension_semantics=("arbitrary", "arbitrary"),
            vmem_limit_bytes=vmem_budget),
        cost_estimate=pl.CostEstimate(flops=flops,
                                      transcendentals=int(2 * n_edges * dp),
                                      bytes_accessed=bytes_accessed),
    )(h_p, e_p, st, wh, bh, wc, bc)

    return h_out_p[:n, :d_out], e_out_p[:, :d_out]


def reference(h, e, S, T, p):
    """Pure-JAX reference mirroring the PyTorch forward (aggr='sum', BN train-mode)."""
    Ah = h @ p["wa"] + p["ba"]
    Bh = h @ p["wb"] + p["bb"]
    Ce = e @ p["wc"] + p["bc"]
    Dh = h @ p["wd"] + p["bd"]
    Eh = h @ p["we"] + p["be"]
    e_new = S @ Dh + T @ Eh + Ce
    sigma = jax.nn.sigmoid(e_new)
    sum_sigma = T.T @ sigma
    eee = Bh / (sum_sigma + AGG_EPS)
    sum_sigma_h = T.T @ ((S @ eee) * sigma)
    h_new = Ah + sum_sigma_h

    def bn(x):
        mu = x.mean(0, keepdims=True)
        var = ((x - mu) ** 2).mean(0, keepdims=True)
        return (x - mu) / jnp.sqrt(var + BN_EPS)

    h_out = h + jnp.maximum(bn(h_new), 0.0)
    e_out = e + jnp.maximum(bn(e_new), 0.0)
    return h_out, e_out


def make_params(key, din, dout):
    ks = jax.random.split(key, 10)
    bound = 1.0 / np.sqrt(din)

    def lin(kw, kb):
        w = jax.random.uniform(kw, (din, dout), jnp.float32, -bound, bound)
        b = jax.random.uniform(kb, (1, dout), jnp.float32, -bound, bound)
        return w, b

    wa, ba = lin(ks[0], ks[1])
    wb, bb = lin(ks[2], ks[3])
    wc, bc = lin(ks[4], ks[5])
    wd, bd = lin(ks[6], ks[7])
    we, be = lin(ks[8], ks[9])
    return dict(wa=wa, ba=ba, wb=wb, bb=bb, wc=wc, bc=bc,
                wd=wd, bd=bd, we=we, be=be)


if __name__ == "__main__":
    N, E_EDGES, D = 8, 32, 32   # input_dim == output_dim == 32 (residual active)

    key = jax.random.PRNGKey(0)
    k_h, k_e, k_p = jax.random.split(key, 3)

    h = jax.random.normal(k_h, (N, D), jnp.float32)
    e = jax.random.normal(k_e, (E_EDGES, D), jnp.float32)
    params = make_params(k_p, D, D)

    # Deterministic graph: ring with +1..+4 hop edges (E = 4*N = 32).
    src = np.concatenate([np.arange(N)] * 4)
    dst = np.concatenate([(np.arange(N) + k) % N for k in (1, 2, 3, 4)])
    S_np = np.zeros((E_EDGES, N), np.float32); S_np[np.arange(E_EDGES), src] = 1.0
    T_np = np.zeros((E_EDGES, N), np.float32); T_np[np.arange(E_EDGES), dst] = 1.0
    S = jnp.asarray(S_np)
    T = jnp.asarray(T_np)

    # edge_block=16 -> 2 edge tiles, exercising the tiled accumulation path.
    h_out, e_out = gated_test_layer(h, e, S, T, params, edge_block=16)
    jax.block_until_ready((h_out, e_out))

    h_ref, e_ref = reference(h, e, S, T, params)
    np.testing.assert_allclose(np.asarray(h_out), np.asarray(h_ref), rtol=1e-5, atol=1e-5)
    np.testing.assert_allclose(np.asarray(e_out), np.asarray(e_ref), rtol=1e-5, atol=1e-5)

    print("KERNEL_OK")
</pallas_src>

<mosaic_0001>
module attributes {stable_mosaic.version = 11 : i64} {
  func.func @gated_gcn_kernel(%arg0: i32, %arg1: i32, %arg2: memref<128x128xf32, #tpu.memory_space<vmem>>, %arg3: memref<16x128xf32, #tpu.memory_space<vmem>>, %arg4: memref<16x256xbf16, #tpu.memory_space<vmem>>, %arg5: memref<128x512xf32, #tpu.memory_space<vmem>>, %arg6: memref<1x512xf32, #tpu.memory_space<vmem>>, %arg7: memref<128x128xf32, #tpu.memory_space<vmem>>, %arg8: memref<1x128xf32, #tpu.memory_space<vmem>>, %arg9: memref<128x128xf32, #tpu.memory_space<vmem>>, %arg10: memref<16x128xf32, #tpu.memory_space<vmem>>, %arg11: memref<128x256xf32, #tpu.memory_space<vmem>>, %arg12: memref<256x128xf32, #tpu.memory_space<vmem>>, %arg13: memref<128x128xf32, #tpu.memory_space<vmem>>, %arg14: memref<128x128xf32, #tpu.memory_space<vmem>>, %arg15: memref<1x128xf32, #tpu.memory_space<vmem>>, %arg16: memref<1x128xf32, #tpu.memory_space<vmem>>, %arg17: memref<128x128xf32, #tpu.memory_space<vmem>>, %arg18: memref<32x128xf32, #tpu.memory_space<vmem>>) attributes {dimension_semantics = [#tpu.dimension_semantics<arbitrary>, #tpu.dimension_semantics<arbitrary>], iteration_bounds = array<i64: 2, 2>, scalar_prefetch = 0 : i64, scratch_operands = 8 : i64, tpu.core_type = #tpu.core_type<tc>, window_params = [{pipeline_mode = #tpu.pipeline_mode<synchronous>, transform_indices = @transform_0, window_bounds = array<i64: 128, 128>}, {transform_indices = @transform_1, window_bounds = array<i64: 16, 128>}, {transform_indices = @transform_2, window_bounds = array<i64: 16, 256>}, {pipeline_mode = #tpu.pipeline_mode<synchronous>, transform_indices = @transform_3, window_bounds = array<i64: 128, 512>}, {pipeline_mode = #tpu.pipeline_mode<synchronous>, transform_indices = @transform_4, window_bounds = array<i64: 1, 512>}, {pipeline_mode = #tpu.pipeline_mode<synchronous>, transform_indices = @transform_5, window_bounds = array<i64: 128, 128>}, {pipeline_mode = #tpu.pipeline_mode<synchronous>, transform_indices = @transform_6, window_bounds = array<i64: 1, 128>}, {pipeline_mode = #tpu.pipeline_mode<synchronous>, transform_indices = @transform_7, window_bounds = array<i64: 128, 128>}, {transform_indices = @transform_8, window_bounds = array<i64: 16, 128>}]} {
    %c0_i32 = arith.constant 0 : i32
    %0 = arith.cmpi eq, %arg0, %c0_i32 : i32
    %c0_i32_0 = arith.constant 0 : i32
    %1 = arith.cmpi eq, %arg1, %c0_i32_0 : i32
    %2 = arith.andi %0, %1 : i1
    %3 = arith.extui %2 : i1 to i32
    %c0_i32_1 = arith.constant 0 : i32
    %4 = arith.cmpi ne, %3, %c0_i32_1 : i32
    scf.if %4 {
      %c0_6 = arith.constant 0 : index
      %c0_7 = arith.constant 0 : index
      %16 = vector.load %arg2[%c0_6, %c0_7] : memref<128x128xf32, #tpu.memory_space<vmem>>, vector<128x128xf32>
      %c0_8 = arith.constant 0 : index
      %c0_9 = arith.constant 0 : index
      %17 = vector.load %arg5[%c0_8, %c0_9] : memref<128x512xf32, #tpu.memory_space<vmem>>, vector<128x512xf32>
      %cst = arith.constant dense<0.000000e+00> : vector<128x512xf32>
      %18 = tpu.matmul %16, %17, %cst {dimension_numbers = #tpu.dot_dimension_numbers<[1], [0], [0], [1], [0, 0, 1, 1], [], []>} : vector<128x128xf32>, vector<128x512xf32>, vector<128x512xf32> -> vector<128x512xf32>
      %c0_10 = arith.constant 0 : index
      %c0_11 = arith.constant 0 : index
      %19 = vector.load %arg6[%c0_10, %c0_11] : memref<1x512xf32, #tpu.memory_space<vmem>>, vector<1x512xf32>
      %20 = vector.broadcast %19 : vector<1x512xf32> to vector<128x512xf32>
      %21 = arith.addf %18, %20 : vector<128x512xf32>
      %22 = vector.extract_strided_slice %21 {offsets = [0, 0], sizes = [128, 256], strides = [1, 1]} : vector<128x512xf32> to vector<128x256xf32>
      %c0_12 = arith.constant 0 : index
      %c0_13 = arith.constant 0 : index
      %23 = vector.load %arg11[%c0_12, %c0_13] : memref<128x256xf32, #tpu.memory_space<vmem>>, vector<128x256xf32>
      tpu.vector_store %arg11[%c0_12, %c0_13], %22 {strides = array<i32>} : memref<128x256xf32, #tpu.memory_space<vmem>>, vector<128x256xf32>,
      %24 = vector.extract_strided_slice %21 {offsets = [0, 256], sizes = [128, 128], strides = [1, 1]} : vector<128x512xf32> to vector<128x128xf32>
      %c0_14 = arith.constant 0 : index
      %c0_15 = arith.constant 0 : index
      %25 = vector.load %arg12[%c0_14, %c0_15] : memref<256x128xf32, #tpu.memory_space<vmem>>, vector<128x128xf32>
      tpu.vector_store %arg12[%c0_14, %c0_15], %24 {strides = array<i32>} : memref<256x128xf32, #tpu.memory_space<vmem>>, vector<128x128xf32>,
      %26 = vector.extract_strided_slice %21 {offsets = [0, 384], sizes = [128, 128], strides = [1, 1]} : vector<128x512xf32> to vector<128x128xf32>
      %c128 = arith.constant 128 : index
      %c0_16 = arith.constant 0 : index
      %27 = vector.load %arg12[%c128, %c0_16] : memref<256x128xf32, #tpu.memory_space<vmem>>, vector<128x128xf32>
      tpu.vector_store %arg12[%c128, %c0_16], %26 {strides = array<i32>} : memref<256x128xf32, #tpu.memory_space<vmem>>, vector<128x128xf32>,
      %cst_17 = arith.constant 0.000000e+00 : f32
      %28 = vector.broadcast %cst_17 : f32 to vector<128x128xf32>
      %c0_18 = arith.constant 0 : index
      %c0_19 = arith.constant 0 : index
      %29 = vector.load %arg13[%c0_18, %c0_19] : memref<128x128xf32, #tpu.memory_space<vmem>>, vector<128x128xf32>
      tpu.vector_store %arg13[%c0_18, %c0_19], %28 {strides = array<i32>} : memref<128x128xf32, #tpu.memory_space<vmem>>, vector<128x128xf32>,
      %cst_20 = arith.constant 0.000000e+00 : f32
      %30 = vector.broadcast %cst_20 : f32 to vector<128x128xf32>
      %c0_21 = arith.constant 0 : index
      %c0_22 = arith.constant 0 : index
      %31 = vector.load %arg14[%c0_21, %c0_22] : memref<128x128xf32, #tpu.memory_space<vmem>>, vector<128x128xf32>
      tpu.vector_store %arg14[%c0_21, %c0_22], %30 {strides = array<i32>} : memref<128x128xf32, #tpu.memory_space<vmem>>, vector<128x128xf32>,
      %cst_23 = arith.constant 0.000000e+00 : f32
      %32 = vector.broadcast %cst_23 : f32 to vector<1x128xf32>
      %c0_24 = arith.constant 0 : index
      %c0_25 = arith.constant 0 : index
      %33 = vector.load %arg15[%c0_24, %c0_25] : memref<1x128xf32, #tpu.memory_space<vmem>>, vector<1x128xf32>
      tpu.vector_store %arg15[%c0_24, %c0_25], %32 {strides = array<i32>} : memref<1x128xf32, #tpu.memory_space<vmem>>, vector<1x128xf32>,
      %cst_26 = arith.constant 0.000000e+00 : f32
      %34 = vector.broadcast %cst_26 : f32 to vector<1x128xf32>
      %c0_27 = arith.constant 0 : index
      %c0_28 = arith.constant 0 : index
      %35 = vector.load %arg16[%c0_27, %c0_28] : memref<1x128xf32, #tpu.memory_space<vmem>>, vector<1x128xf32>
      tpu.vector_store %arg16[%c0_27, %c0_28], %34 {strides = array<i32>} : memref<1x128xf32, #tpu.memory_space<vmem>>, vector<1x128xf32>,
    } else {
    }
    %c0 = arith.constant 0 : index
    %c0_2 = arith.constant 0 : index
    %5 = vector.load %arg4[%c0, %c0_2] : memref<16x256xbf16, #tpu.memory_space<vmem>>, vector<16x256xbf16>
    %6 = arith.extf %5 : vector<16x256xbf16> to vector<16x256xf32>
    %7 = vector.extract_strided_slice %6 {offsets = [0, 128], sizes = [16, 128], strides = [1, 1]} : vector<16x256xf32> to vector<16x128xf32>
    %c16_i32 = arith.constant 16 : i32
    %8 = arith.muli %arg1, %c16_i32 : i32
    %9 = tpu.assume_multiple %8, 16 : i32
    %c0_i32_3 = arith.constant 0 : i32
    %10 = arith.cmpi eq, %arg0, %c0_i32_3 : i32
    %11 = arith.extui %10 : i1 to i32
    %c0_i32_4 = arith.constant 0 : i32
    %12 = arith.cmpi ne, %11, %c0_i32_4 : i32
    scf.if %12 {
      %c0_6 = arith.constant 0 : index
      %c0_7 = arith.constant 0 : index
      %16 = vector.load %arg3[%c0_6, %c0_7] : memref<16x128xf32, #tpu.memory_space<vmem>>, vector<16x128xf32>
      %c0_8 = arith.constant 0 : index
      %c0_9 = arith.constant 0 : index
      %17 = vector.load %arg7[%c0_8, %c0_9] : memref<128x128xf32, #tpu.memory_space<vmem>>, vector<128x128xf32>
      %cst = arith.constant dense<0.000000e+00> : vector<16x128xf32>
      %18 = tpu.matmul %16, %17, %cst {dimension_numbers = #tpu.dot_dimension_numbers<[1], [0], [0], [1], [0, 0, 1, 1], [], []>} : vector<16x128xf32>, vector<128x128xf32>, vector<16x128xf32> -> vector<16x128xf32>
      %c0_10 = arith.constant 0 : index
      %c0_11 = arith.constant 0 : index
      %19 = vector.load %arg8[%c0_10, %c0_11] : memref<1x128xf32, #tpu.memory_space<vmem>>, vector<1x128xf32>
      %20 = vector.broadcast %19 : vector<1x128xf32> to vector<16x128xf32>
      %21 = arith.addf %18, %20 : vector<16x128xf32>
      %c0_12 = arith.constant 0 : index
      %c0_13 = arith.constant 0 : index
      %22 = vector.load %arg12[%c0_12, %c0_13] : memref<256x128xf32, #tpu.memory_space<vmem>>, vector<256x128xf32>
      %cst_14 = arith.constant dense<0.000000e+00> : vector<16x128xf32>
      %23 = tpu.matmul %6, %22, %cst_14 {dimension_numbers = #tpu.dot_dimension_numbers<[1], [0], [0], [1], [0, 0, 1, 1], [], []>} : vector<16x256xf32>, vector<256x128xf32>, vector<16x128xf32> -> vector<16x128xf32>
      %24 = arith.addf %23, %21 : vector<16x128xf32>
      %25 = arith.negf %24 : vector<16x128xf32>
      %26 = math.exp %25 : vector<16x128xf32>
      %cst_15 = arith.constant 1.000000e+00 : f32
      %27 = vector.broadcast %cst_15 : f32 to vector<16x128xf32>
      %28 = arith.addf %27, %26 : vector<16x128xf32>
      %29 = arith.divf %27, %28 : vector<16x128xf32>
      %30 = arith.index_cast %9 : i32 to index
      %c0_16 = arith.constant 0 : index
      %31 = vector.load %arg18[%30, %c0_16] : memref<32x128xf32, #tpu.memory_space<vmem>>, vector<16x128xf32>
      tpu.vector_store %arg18[%30, %c0_16], %24 {strides = array<i32>} : memref<32x128xf32, #tpu.memory_space<vmem>>, vector<16x128xf32>,
      %c0_17 = arith.constant 0 : index
      %c0_18 = arith.constant 0 : index
      %32 = vector.load %arg13[%c0_17, %c0_18] : memref<128x128xf32, #tpu.memory_space<vmem>>, vector<128x128xf32>
      %cst_19 = arith.constant dense<0.000000e+00> : vector<128x128xf32>
      %33 = tpu.matmul %7, %29, %cst_19 {dimension_numbers = #tpu.dot_dimension_numbers<[0], [0], [1], [1], [0, 1, 1, 1], [], []>} : vector<16x128xf32>, vector<16x128xf32>, vector<128x128xf32> -> vector<128x128xf32>
      %34 = arith.addf %32, %33 : vector<128x128xf32>
      %c0_20 = arith.constant 0 : index
      %c0_21 = arith.constant 0 : index
      %35 = vector.load %arg13[%c0_20, %c0_21] : memref<128x128xf32, #tpu.memory_space<vmem>>, vector<128x128xf32>
      tpu.vector_store %arg13[%c0_20, %c0_21], %34 {strides = array<i32>} : memref<128x128xf32, #tpu.memory_space<vmem>>, vector<128x128xf32>,
      %c0_22 = arith.constant 0 : index
      %c0_23 = arith.constant 0 : index
      %36 = vector.load %arg15[%c0_22, %c0_23] : memref<1x128xf32, #tpu.memory_space<vmem>>, vector<1x128xf32>
      %cst_24 = arith.constant dense<0.000000e+00> : vector<128xf32>
      %37 = vector.multi_reduction <add>, %24, %cst_24 [0] : vector<16x128xf32> to vector<128xf32>
      %38 = vector.shape_cast %37 : vector<128xf32> to vector<1x128xf32>
      %39 = arith.addf %36, %38 : vector<1x128xf32>
      %c0_25 = arith.constant 0 : index
      %c0_26 = arith.constant 0 : index
      %40 = vector.load %arg15[%c0_25, %c0_26] : memref<1x128xf32, #tpu.memory_space<vmem>>, vector<1x128xf32>
      tpu.vector_store %arg15[%c0_25, %c0_26], %39 {strides = array<i32>} : memref<1x128xf32, #tpu.memory_space<vmem>>, vector<1x128xf32>,
      %c0_27 = arith.constant 0 : index
      %c0_28 = arith.constant 0 : index
      %41 = vector.load %arg16[%c0_27, %c0_28] : memref<1x128xf32, #tpu.memory_space<vmem>>, vector<1x128xf32>
      %42 = arith.mulf %24, %24 : vector<16x128xf32>
      %cst_29 = arith.constant dense<0.000000e+00> : vector<128xf32>
      %43 = vector.multi_reduction <add>, %42, %cst_29 [0] : vector<16x128xf32> to vector<128xf32>
      %44 = vector.shape_cast %43 : vector<128xf32> to vector<1x128xf32>
      %45 = arith.addf %41, %44 : vector<1x128xf32>
      %c0_30 = arith.constant 0 : index
      %c0_31 = arith.constant 0 : index
      %46 = vector.load %arg16[%c0_30, %c0_31] : memref<1x128xf32, #tpu.memory_space<vmem>>, vector<1x128xf32>
      tpu.vector_store %arg16[%c0_30, %c0_31], %45 {strides = array<i32>} : memref<1x128xf32, #tpu.memory_space<vmem>>, vector<1x128xf32>,
    } else {
    }
    %c1_i32 = arith.constant 1 : i32
    %13 = arith.cmpi eq, %arg0, %c1_i32 : i32
    %14 = arith.extui %13 : i1 to i32
    %c0_i32_5 = arith.constant 0 : i32
    %15 = arith.cmpi ne, %14, %c0_i32_5 : i32
    scf.if %15 {
      %c0_i32_6 = arith.constant 0 : i32
      %16 = arith.cmpi eq, %arg1, %c0_i32_6 : i32
      %17 = arith.extui %16 : i1 to i32
      %c0_i32_7 = arith.constant 0 : i32
      %18 = arith.cmpi ne, %17, %c0_i32_7 : i32
      scf.if %18 {
        %c0_32 = arith.constant 0 : index
        %c128 = arith.constant 128 : index
        %59 = vector.load %arg11[%c0_32, %c128] : memref<128x256xf32, #tpu.memory_space<vmem>>, vector<128x128xf32>
        %c0_33 = arith.constant 0 : index
        %c0_34 = arith.constant 0 : index
        %60 = vector.load %arg13[%c0_33, %c0_34] : memref<128x128xf32, #tpu.memory_space<vmem>>, vector<128x128xf32>
        %cst_35 = arith.constant 9.99999997E-7 : f32
        %61 = vector.broadcast %cst_35 : f32 to vector<128x128xf32>
        %62 = arith.addf %60, %61 : vector<128x128xf32>
        %63 = tpu.reciprocal %62 : vector<128x128xf32> -> vector<128x128xf32>
        %64 = arith.mulf %59, %63 : vector<128x128xf32>
        %c0_36 = arith.constant 0 : index
        %c0_37 = arith.constant 0 : index
        %65 = vector.load %arg17[%c0_36, %c0_37] : memref<128x128xf32, #tpu.memory_space<vmem>>, vector<128x128xf32>
        tpu.vector_store %arg17[%c0_36, %c0_37], %64 {strides = array<i32>} : memref<128x128xf32, #tpu.memory_space<vmem>>, vector<128x128xf32>,
      } else {
      }
      %19 = arith.index_cast %9 : i32 to index
      %c0_8 = arith.constant 0 : index
      %20 = vector.load %arg18[%19, %c0_8] : memref<32x128xf32, #tpu.memory_space<vmem>>, vector<16x128xf32>
      %21 = arith.negf %20 : vector<16x128xf32>
      %22 = math.exp %21 : vector<16x128xf32>
      %cst = arith.constant 1.000000e+00 : f32
      %23 = vector.broadcast %cst : f32 to vector<16x128xf32>
      %24 = arith.addf %23, %22 : vector<16x128xf32>
      %25 = arith.divf %23, %24 : vector<16x128xf32>
      %26 = vector.extract_strided_slice %6 {offsets = [0, 0], sizes = [16, 128], strides = [1, 1]} : vector<16x256xf32> to vector<16x128xf32>
      %c0_9 = arith.constant 0 : index
      %c0_10 = arith.constant 0 : index
      %27 = vector.load %arg17[%c0_9, %c0_10] : memref<128x128xf32, #tpu.memory_space<vmem>>, vector<128x128xf32>
      %cst_11 = arith.constant dense<0.000000e+00> : vector<16x128xf32>
      %28 = tpu.matmul %26, %27, %cst_11 {dimension_numbers = #tpu.dot_dimension_numbers<[1], [0], [0], [1], [0, 0, 1, 1], [], []>} : vector<16x128xf32>, vector<128x128xf32>, vector<16x128xf32> -> vector<16x128xf32>
      %29 = arith.mulf %28, %25 : vector<16x128xf32>
      %c0_12 = arith.constant 0 : index
      %c0_13 = arith.constant 0 : index
      %30 = vector.load %arg14[%c0_12, %c0_13] : memref<128x128xf32, #tpu.memory_space<vmem>>, vector<128x128xf32>
      %cst_14 = arith.constant dense<0.000000e+00> : vector<128x128xf32>
      %31 = tpu.matmul %7, %29, %cst_14 {dimension_numbers = #tpu.dot_dimension_numbers<[0], [0], [1], [1], [0, 1, 1, 1], [], []>} : vector<16x128xf32>, vector<16x128xf32>, vector<128x128xf32> -> vector<128x128xf32>
      %32 = arith.addf %30, %31 : vector<128x128xf32>
      %c0_15 = arith.constant 0 : index
      %c0_16 = arith.constant 0 : index
      %33 = vector.load %arg14[%c0_15, %c0_16] : memref<128x128xf32, #tpu.memory_space<vmem>>, vector<128x128xf32>
      tpu.vector_store %arg14[%c0_15, %c0_16], %32 {strides = array<i32>} : memref<128x128xf32, #tpu.memory_space<vmem>>, vector<128x128xf32>,
      %c0_17 = arith.constant 0 : index
      %c0_18 = arith.constant 0 : index
      %34 = vector.load %arg15[%c0_17, %c0_18] : memref<1x128xf32, #tpu.memory_space<vmem>>, vector<1x128xf32>
      %cst_19 = arith.constant 3.125000e-02 : f32
      %35 = vector.broadcast %cst_19 : f32 to vector<1x128xf32>
      %36 = arith.mulf %34, %35 : vector<1x128xf32>
      %c0_20 = arith.constant 0 : index
      %c0_21 = arith.constant 0 : index
      %37 = vector.load %arg16[%c0_20, %c0_21] : memref<1x128xf32, #tpu.memory_space<vmem>>, vector<1x128xf32>
      %cst_22 = arith.constant 3.125000e-02 : f32
      %38 = vector.broadcast %cst_22 : f32 to vector<1x128xf32>
      %39 = arith.mulf %37, %38 : vector<1x128xf32>
      %40 = arith.mulf %36, %36 : vector<1x128xf32>
      %41 = arith.subf %39, %40 : vector<1x128xf32>
      %cst_23 = arith.constant 0.000000e+00 : f32
      %42 = vector.broadcast %cst_23 : f32 to vector<1x128xf32>
      %43 = arith.maximumf %41, %42 : vector<1x128xf32>
      %44 = vector.broadcast %36 : vector<1x128xf32> to vector<16x128xf32>
      %45 = arith.subf %20, %44 : vector<16x128xf32>
      %cst_24 = arith.constant 9.99999974E-6 : f32
      %46 = vector.broadcast %cst_24 : f32 to vector<1x128xf32>
      %47 = arith.addf %43, %46 : vector<1x128xf32>
      %48 = math.rsqrt %47 : vector<1x128xf32>
      %49 = vector.broadcast %48 : vector<1x128xf32> to vector<16x128xf32>
      %50 = arith.mulf %45, %49 : vector<16x128xf32>
      %c0_25 = arith.constant 0 : index
      %c0_26 = arith.constant 0 : index
      %51 = vector.load %arg3[%c0_25, %c0_26] : memref<16x128xf32, #tpu.memory_space<vmem>>, vector<16x128xf32>
      %cst_27 = arith.constant 0.000000e+00 : f32
      %52 = vector.broadcast %cst_27 : f32 to vector<16x128xf32>
      %53 = arith.maximumf %50, %52 : vector<16x128xf32>
      %54 = arith.addf %51, %53 : vector<16x128xf32>
      %c0_28 = arith.constant 0 : index
      %c0_29 = arith.constant 0 : index
      %55 = vector.load %arg10[%c0_28, %c0_29] : memref<16x128xf32, #tpu.memory_space<vmem>>, vector<16x128xf32>
      tpu.vector_store %arg10[%c0_28, %c0_29], %54 {strides = array<i32>} : memref<16x128xf32, #tpu.memory_space<vmem>>, vector<16x128xf32>,
      %c1_i32_30 = arith.constant 1 : i32
      %56 = arith.cmpi eq, %arg1, %c1_i32_30 : i32
      %57 = arith.extui %56 : i1 to i32
      %c0_i32_31 = arith.constant 0 : i32
      %58 = arith.cmpi ne, %57, %c0_i32_31 : i32
      scf.if %58 {
        %c0_32 = arith.constant 0 : index
        %c0_33 = arith.constant 0 : index
        %59 = vector.load %arg11[%c0_32, %c0_33] : memref<128x256xf32, #tpu.memory_space<vmem>>, vector<128x128xf32>
        %c0_34 = arith.constant 0 : index
        %c0_35 = arith.constant 0 : index
        %60 = vector.load %arg14[%c0_34, %c0_35] : memref<128x128xf32, #tpu.memory_space<vmem>>, vector<128x128xf32>
        %61 = arith.addf %59, %60 : vector<128x128xf32>
        %62 = tpu.iota {dimensions = array<i32: 0>} : vector<128x1xi32>
        %c8_i32 = arith.constant 8 : i32
        %63 = vector.broadcast %c8_i32 : i32 to vector<128x1xi32>
        %64 = arith.cmpi slt, %62, %63 : vector<128x1xi32>
        %cst_36 = arith.constant 0.000000e+00 : f32
        %65 = vector.shape_cast %64 : vector<128x1xi1> to vector<128x1xi1>
        %66 = vector.broadcast %65 : vector<128x1xi1> to vector<128x128xi1>
        %67 = vector.broadcast %cst_36 : f32 to vector<128x128xf32>
        %68 = arith.select %66, %61, %67 : vector<128x128xi1>, vector<128x128xf32>
        %cst_37 = arith.constant dense<0.000000e+00> : vector<128xf32>
        %69 = vector.multi_reduction <add>, %68, %cst_37 [0] : vector<128x128xf32> to vector<128xf32>
        %70 = vector.shape_cast %69 : vector<128xf32> to vector<1x128xf32>
        %cst_38 = arith.constant 1.250000e-01 : f32
        %71 = vector.broadcast %cst_38 : f32 to vector<1x128xf32>
        %72 = arith.mulf %70, %71 : vector<1x128xf32>
        %73 = vector.broadcast %72 : vector<1x128xf32> to vector<128x128xf32>
        %74 = arith.subf %61, %73 : vector<128x128xf32>
        %cst_39 = arith.constant 0.000000e+00 : f32
        %75 = vector.shape_cast %64 : vector<128x1xi1> to vector<128x1xi1>
        %76 = vector.broadcast %75 : vector<128x1xi1> to vector<128x128xi1>
        %77 = vector.broadcast %cst_39 : f32 to vector<128x128xf32>
        %78 = arith.select %76, %74, %77 : vector<128x128xi1>, vector<128x128xf32>
        %79 = arith.mulf %78, %78 : vector<128x128xf32>
        %cst_40 = arith.constant dense<0.000000e+00> : vector<128xf32>
        %80 = vector.multi_reduction <add>, %79, %cst_40 [0] : vector<128x128xf32> to vector<128xf32>
        %81 = vector.shape_cast %80 : vector<128xf32> to vector<1x128xf32>
        %cst_41 = arith.constant 1.250000e-01 : f32
        %82 = vector.broadcast %cst_41 : f32 to vector<1x128xf32>
        %83 = arith.mulf %81, %82 : vector<1x128xf32>
        %84 = vector.broadcast %72 : vector<1x128xf32> to vector<128x128xf32>
        %85 = arith.subf %61, %84 : vector<128x128xf32>
        %cst_42 = arith.constant 9.99999974E-6 : f32
        %86 = vector.broadcast %cst_42 : f32 to vector<1x128xf32>
        %87 = arith.addf %83, %86 : vector<1x128xf32>
        %88 = math.rsqrt %87 : vector<1x128xf32>
        %89 = vector.broadcast %88 : vector<1x128xf32> to vector<128x128xf32>
        %90 = arith.mulf %85, %89 : vector<128x128xf32>
        %c0_43 = arith.constant 0 : index
        %c0_44 = arith.constant 0 : index
        %91 = vector.load %arg2[%c0_43, %c0_44] : memref<128x128xf32, #tpu.memory_space<vmem>>, vector<128x128xf32>
        %cst_45 = arith.constant 0.000000e+00 : f32
        %92 = vector.broadcast %cst_45 : f32 to vector<128x128xf32>
        %93 = arith.maximumf %90, %92 : vector<128x128xf32>
        %94 = arith.addf %91, %93 : vector<128x128xf32>
        %c0_46 = arith.constant 0 : index
        %c0_47 = arith.constant 0 : index
        %95 = vector.load %arg9[%c0_46, %c0_47] : memref<128x128xf32, #tpu.memory_space<vmem>>, vector<128x128xf32>
        tpu.vector_store %arg9[%c0_46, %c0_47], %94 {strides = array<i32>} : memref<128x128xf32, #tpu.memory_space<vmem>>, vector<128x128xf32>,
      } else {
      }
    } else {
    }
    return
  }
  func.func @transform_0(%arg0: i32, %arg1: i32) -> (i32, i32) {
    %c0_i32 = arith.constant 0 : i32
    %c0_i32_0 = arith.constant 0 : i32
    %c0_i32_1 = arith.constant 0 : i32
    return %c0_i32, %c0_i32_0 : i32, i32
  }
  func.func @transform_1(%arg0: i32, %arg1: i32) -> (i32, i32) {
    %c0_i32 = arith.constant 0 : i32
    %c0_i32_0 = arith.constant 0 : i32
    return %arg1, %c0_i32 : i32, i32
  }
  func.func @transform_2(%arg0: i32, %arg1: i32) -> (i32, i32) {
    %c0_i32 = arith.constant 0 : i32
    %c0_i32_0 = arith.constant 0 : i32
    return %arg1, %c0_i32 : i32, i32
  }
  func.func @transform_3(%arg0: i32, %arg1: i32) -> (i32, i32) {
    %c0_i32 = arith.constant 0 : i32
    %c0_i32_0 = arith.constant 0 : i32
    %c0_i32_1 = arith.constant 0 : i32
    return %c0_i32, %c0_i32_0 : i32, i32
  }
  func.func @transform_4(%arg0: i32, %arg1: i32) -> (i32, i32) {
    %c0_i32 = arith.constant 0 : i32
    %c0_i32_0 = arith.constant 0 : i32
    %c0_i32_1 = arith.constant 0 : i32
    return %c0_i32, %c0_i32_0 : i32, i32
  }
  func.func @transform_5(%arg0: i32, %arg1: i32) -> (i32, i32) {
    %c0_i32 = arith.constant 0 : i32
    %c0_i32_0 = arith.constant 0 : i32
    %c0_i32_1 = arith.constant 0 : i32
    return %c0_i32, %c0_i32_0 : i32, i32
  }
  func.func @transform_6(%arg0: i32, %arg1: i32) -> (i32, i32) {
    %c0_i32 = arith.constant 0 : i32
    %c0_i32_0 = arith.constant 0 : i32
    %c0_i32_1 = arith.constant 0 : i32
    return %c0_i32, %c0_i32_0 : i32, i32
  }
  func.func @transform_7(%arg0: i32, %arg1: i32) -> (i32, i32) {
    %c0_i32 = arith.constant 0 : i32
    %c0_i32_0 = arith.constant 0 : i32
    %c0_i32_1 = arith.constant 0 : i32
    return %c0_i32, %c0_i32_0 : i32, i32
  }
  func.func @transform_8(%arg0: i32, %arg1: i32) -> (i32, i32) {
    %0 = arith.muli %arg0, %arg1 : i32
    %c0_i32 = arith.constant 0 : i32
    %c0_i32_0 = arith.constant 0 : i32
    return %0, %c0_i32 : i32, i32
  }
}

</mosaic_0001>

<bundles_post_ra>
// kernel: tpu_custom_call.1
= control target key start
LH: loop header
LB: loop body
LE: loop exit
PB: predicated region body
PF: predicated region fallthrough
CT: control target
= control target key end

     0   :  { %s3966_s0 = inlined_call_operand.hbm [shape: f32[128,128], index: 0, kind: input, shape index: {}]   ;;  %s3967_s1 = inlined_call_operand.hbm [shape: f32[32,128], index: 1, kind: input, shape index: {}]   ;;  %s3968_s2 = inlined_call_operand.hbm [shape: bf16[32,256], index: 2, kind: input, shape index: {}]   ;;  %s3969_s3 = inlined_call_operand.hbm [shape: f32[128,512], index: 3, kind: input, shape index: {}]   ;;  %s3970_s4 = inlined_call_operand.vmem [shape: f32[1,512], index: 4, kind: input, shape index: {}]   ;;  %s3971_s5 = inlined_call_operand.hbm [shape: f32[128,128], index: 5, kind: input, shape index: {}]   ;;  %s3972_s6 = inlined_call_operand.vmem [shape: f32[1,128], index: 6, kind: input, shape index: {}]   ;;  %s3973_s7 = inlined_call_operand.hbm [shape: f32[128,128], index: 7, kind: output, shape index: {0}]   ;;  %s3974_s8 = inlined_call_operand.hbm [shape: f32[32,128], index: 8, kind: output, shape index: {1}]  }
   0x1   :  { %3988 = sst [smem:[#allocation37_spill]] %s3967_s1 }
   0x2   :  { %3989 = sst [smem:[#allocation38_spill]] %s3969_s3 }
   0x3   :  { %3990 = sst [smem:[#allocation39_spill]] %s3970_s4 }
   0x4   :  { %3991 = sst [smem:[#allocation40_spill]] %s3972_s6 }
   0x5   :  { %3992 = sst [smem:[#allocation41_spill]] %s3973_s7 }
   0x6   :  { %3993 = sst [smem:[#allocation42_spill]] %s3974_s8 }
   0x7   :  { %14 = vsyncpa [#allocation11], 0 }
   0x8   :  { %15 = vsyncpa [#allocation14], 0 }
   0x9   :  { %17 = vsyncpa [#allocation14 + $0x1], 0 }
   0xa   :  { %18 = vsyncpa [#allocation17], 0 }
   0xb   :  { %19 = vsyncpa [#allocation12], 0 }
   0xc   :  { %20 = vsyncpa [#allocation21], 0 }
   0xd   :  { %22 = vsyncpa [#allocation21 + $0x1], 0  ;;  %s3355_s27 = smov 0   ;;  %s3357_s28 = smov 0  }
   0xe   :  { %s3359_s29 = smov 0   ;;  %s3361_s30 = smov 0  }
   0xf   :  { %s3363_s9 = smov 0   ;;  %s3365_s10 = smov 0  }
  0x10   :  { %s3367_s11 = smov 0   ;;  %s3369_s12 = smov 0  }
  0x11   :  { %s3371_s13 = smov 0   ;;  %s3373_s14 = smov 0  }
  0x12   :  { %s3375_s15 = smov 0  }
  0x13 LB: > { %3994 = sst [smem:[#allocation27_spill]] %s3254_s27  ;;  %s3409_s16 = sadd.s32 4294967295, %s3294_s15   ;;  %s3294_s15 = sphi %s3375_s15, %s28_s15   ;;  %s3290_s14 = sphi %s3373_s14, %s4053_s14   ;;  %s3286_s13 = sphi %s3371_s13, %s4052_s13   ;;  %s3282_s12 = sphi %s3369_s12, %s4043_s12   ;;  %s3278_s11 = sphi %s3367_s11, %s4051_s11   ;;  %s3274_s10 = sphi %s3365_s10, %s4042_s10   ;;  %s3270_s9 = sphi %s3363_s9, %s4050_s9   ;;  %s3266_s30 = sphi %s3361_s30, %s4049_s30   ;;  %s3262_s29 = sphi %s3359_s29, %s4048_s29   ;;  %s3258_s28 = sphi %s3357_s28, %s4047_s28   ;;  %s3254_s27 = sphi %s3355_s27, %s4046_s27  }
  0x14   : > { %3995 = sst [smem:[#allocation28_spill]] %s3274_s10  ;;  %s2485_s17 = sadd.s32 4294967294, %s3294_s15  }
  0x15   : > { %3996 = sst [smem:[#allocation29_spill]] %s3278_s11  ;;  %p81_p0 = scmp.ne.s32.totalorder %s3270_s9, %s3266_s30 }
  0x16   : > { %3997 = sst [smem:[#allocation30_spill]] %s3282_s12  ;;  %p3983_p1 = scmp.eq.s32.totalorder %s3409_s16, 0 }
  0x17   : > { %3998 = sst [smem:[#allocation31_spill]] %s3290_s14  ;;  %p237_p2 = scmp.ne.s32.totalorder %s3262_s29, %s3258_s28 }
  0x18   : > { %p3419_p3 = por %p3983_p1, %p81_p0  ;;  %p3975_p4 = scmp.eq.s32.totalorder %s3409_s16, 3 }
  0x19   : > { %p243_p5 = scmp.ne.s32.totalorder %s3258_s28, %s3254_s27  ;;  %p244_p6 = scmp.eq.s32.totalorder %s2485_s17, 3 }
  0x1a   : > { %p3428_p7 = por %p3975_p4, %p237_p2  ;;  %p2486_p8 = scmp.ge.s32.totalorder %s3294_s15, 1 }
  0x1b   : > { %p3433_p9 = por %p244_p6, %p243_p5  ;;  %p251_p10 = scmp.lt.s32.totalorder %s3294_s15, 5 }
  0x1c   : > { %s4000_s20 = scalar_select %p3428_p7, 1, 0 }
  0x1d   : > { %s4002_s21 = scalar_select %p3433_p9, 1, 0 }
  0x1e   : > { %4001 = sst [smem:[#allocation32_spill]] %s4000_s20  ;;  %p3438_p11 = pnand %p2486_p8, %p251_p10 }
  0x1f   : > { %4003 = sst [smem:[#allocation33_spill]] %s4002_s21  ;;  %s3296_s23 = smov [#allocation16]  }
  0x20   : > { %s276_s24 = sshll.u32 %s3296_s23, 4  ;;  %p2820_p12 = pneg %p3438_p11  ;;  %s277_s24 = int_to_ptr.vmem [resolvable:$true] %s276_s24 }
  0x21   : > { %s3015_s26 = scalar_lea.vmem %s277_s24, 8192  ;;  %p3023_p8 = scmp.lt.s32.totalorder %s277_s24, %s277_s24 }
  0x22   : > { %p3446_p13 = pnand %p2820_p12, %p3983_p1  ;;  %p3016_p2 = scmp.ne.s32.totalorder %s277_s24, %s3015_s26 }
  0x23   : > { %p3024_p10 = scmp.lt.s32.totalorder %s3015_s26, %s3015_s26 }
  0x24   : > { %p3006_p0 = pneg %p3446_p13 }
  0x25   : > { %p3025_p4 = por %p3024_p10, %p3023_p8 }
  0x26   : > { %p3018_p5 = pnand %p3016_p2, %p3006_p0 }
  0x28   : > { %p3019_p6 = pneg %p3018_p5 }
  0x2a   : > { %p3026_p9 = pnand %p3025_p4, %p3019_p6 }
  0x2c   : > { %3029 = shalt.err (!%p3026_p9)
}
  0x2d   : > { %s3297_s30 = smov 512   ;;  %s3298_s17 = smov 32  }
  0x2e   : > { %s4006_s3 = sld [smem:[#allocation38_spill]]  ;;  %s37_s26 = sadd.s32 1, %s3286_s13 }
  0x2f   : > { %p38_p4 = scmp.ge.s32.totalorder %s37_s26, 2  ;;  %s40_s21 = sadd.s32 1, %s3290_s14 }
  0x30   : > { %s68_s27 = sadd.s32 1, %s3274_s10  ;;  %p75_p9 = scmp.ne.s32.totalorder %s3274_s10, %s3270_s9 }
  0x31   : > { %s4055_s26 = smov (%p38_p4, %s37_s26), 0  ;;  %s4057_s21 = smov (!%p38_p4, %s40_s21), %s3290_s14 }
  0x32   : > { %4007 = sst [smem:[#allocation34_spill]] %s4055_s26  ;;  %s65_s8 = ssub.s32 %s3286_s13, %s4055_s26 }
  0x33   : > { %p76_p12 = scmp.eq.s32.totalorder %s3294_s15, 0  ;;  %p42_p2 = scmp.ge.s32.totalorder %s4057_s21, 2 }
  0x34   : > { %2826 = dma.hbm_to_vmem [thread:$0]  (!%p3446_p13), %s4006_s3, 8192, %s277_s24, [#allocation17], %s3297_s30, %s3297_s30, %s3298_s17  }
  0x35   : > { %p66_p5 = scmp.eq.s32.totalorder %s65_s8, 0  ;;  %p3471_p6 = por %p76_p12, %p75_p9 }
  0x36   : > { %s222_s24 = smul.u32 %s3286_s13, %s3290_s14  ;;  %s4059_s21 = smov (%p42_p2, %s4057_s21), 0 }
  0x37   : > { %4009 = sst [smem:[#allocation35_spill]] %s4059_s21  ;;  %s223_s17 = smul.u32 %s4059_s21, %s4055_s26 }
  0x38   : > { %s3480_s30 = scalar_select %p66_p5, %s3274_s10, %s68_s27  }
  0x39   : > { %p2844_p8 = scmp.lt.s32.totalorder %s3294_s15, 4  ;;  %s224_s23 = ssub.s32 %s222_s24, %s223_s17 }
  0x3a   : > { %4010 = sst [smem:[#allocation36_spill]] %s3480_s30  ;;  %s309_s3 = sand.u32 1, %s3294_s15  }
  0x3b   : > { %p225_p10 = scmp.eq.s32.totalorder %s224_s23, 0  ;;  %s311_s7 = sand.u32 1, %s3274_s10  }
  0x3c   : > { %s2554_s20 = sshll.u32 %s3286_s13, 8  ;;  %s4011_s6 = sadd.s32 1, %s3262_s29 }
  0x3d   : > { %s3491_s8 = scalar_select %p225_p10, %s3262_s29, %s4011_s6  }
  0x3e   : > { %s2491_s4 = sshll.u32 %s311_s7, 4  ;;  %s4012_s1 = sld [smem:[#allocation37_spill]] }
  0x3f   : > { %p3500_p4 = pnand %p2844_p8, %p3471_p6  ;;  %s313_s24 = scalar_lea.vmem [#allocation13], %s2491_s4 }
  0x40   : > { %s320_s17 = sshll.u32 %s313_s24, 4  ;;  %s3504_s23 = scalar_lea.sflag [#allocation14], %s309_s3  ;;  %s321_s17 = int_to_ptr.vmem [resolvable:$true] %s320_s17 }
  0x41   : > { %p3987_p9 = pneg %p3500_p4  ;;  %s3043_s6 = scalar_lea.vmem %s321_s17, 256 }
  0x42   : > { %p3044_p12 = scmp.ne.s32.totalorder %s321_s17, %s3043_s6  ;;  %s3299_s7 = smov [#allocation13]  }
  0x43   : > { %s3048_s11 = sshll.u32 %s3299_s7, 4  ;;  %s3049_s11 = int_to_ptr.vmem [resolvable:$false] %s3048_s11 }
  0x44   : > { %s319_s14 = scalar_lea.hbm %s4012_s1, %s2554_s20  ;;  %p3046_p2 = pnand %p3044_p12, %p3987_p9 }
  0x45   : > { %s3050_s12 = scalar_lea.vmem %s3049_s11, 512  ;;  %p3051_p6 = scmp.lt.s32.totalorder %s321_s17, %s3049_s11 }
  0x46   : > { %p3047_p5 = pneg %p3046_p2  ;;  %p3052_p8 = scmp.lt.s32.totalorder %s3050_s12, %s3043_s6 }
  0x48   : > { %p3053_p10 = por %p3052_p8, %p3051_p6 }
  0x4a   : > { %p3054_p1 = pnand %p3053_p10, %p3047_p5 }
  0x4c   : > { %3057 = shalt.err (!%p3054_p1)
}
  0x4d   : > { %s3300_s18 = smov 128   ;;  %s3301_s3 = smov 8  }
  0x4e   : > { %2833 = dma.hbm_to_vmem [thread:$0]  (!%p3500_p4), %s319_s14, 256, %s321_s17, %s3504_s23, %s3300_s18, %s3300_s18, %s3301_s3  }
  0x4f   : > { %s3522_s11 = scalar_lea.hbm %s3968_s2, %s2554_s20  ;;  %s334_s6 = scalar_lea.vmem [#allocation15], %s2491_s4 }
  0x50   : > { %s342_s12 = sshll.u32 %s334_s6, 4  ;;  %s3302_s1 = smov [#allocation10]   ;;  %s3524_s12 = int_to_ptr.vmem [resolvable:$true] %s342_s12 }
  0x51   : > { %s263_s21 = sshll.u32 %s3302_s1, 4  ;;  %s3303_s26 = smov [#allocation18]   ;;  %s264_s21 = int_to_ptr.vmem [resolvable:$true] %s263_s21 }
  0x52   : > { %s292_s30 = sshll.u32 %s3303_s26, 4  ;;  %s3069_s10 = scalar_lea.vmem %s264_s21, 2048  ;;  %s293_s30 = int_to_ptr.vmem [resolvable:$true] %s292_s30 }
  0x53   : > { %p3070_p1 = scmp.ne.s32.totalorder %s264_s21, %s3069_s10  ;;  %p3077_p5 = scmp.lt.s32.totalorder %s264_s21, %s264_s21 }
  0x54   : > { %p3078_p6 = scmp.lt.s32.totalorder %s3069_s10, %s3069_s10 }
  0x55   : > { %p3072_p12 = pnand %p3070_p1, %p3006_p0 }
  0x56   : > { %p3079_p8 = por %p3078_p6, %p3077_p5 }
  0x57   : > { %p3073_p2 = pneg %p3072_p12 }
  0x59   : > { %p3080_p10 = pnand %p3079_p8, %p3073_p2 }
  0x5b   : > { %3083 = shalt.err (!%p3080_p10)
}
  0x5c   : > { %2823 = dma.hbm_to_vmem [thread:$0]  (!%p3446_p13), %s3966_s0, 2048, %s264_s21, [#allocation11], %s3300_s18, %s3300_s18, %s3301_s3  }
  0x5d   : > { %s3095_s14 = scalar_lea.vmem %s293_s30, 2048  ;;  %p3103_p5 = scmp.lt.s32.totalorder %s293_s30, %s293_s30 }
  0x5e   : > { %p3096_p9 = scmp.ne.s32.totalorder %s293_s30, %s3095_s14  ;;  %p3104_p2 = scmp.lt.s32.totalorder %s3095_s14, %s3095_s14 }
  0x60   : > { %p3098_p1 = pnand %p3096_p9, %p3006_p0  ;;  %p3105_p6 = por %p3104_p2, %p3103_p5 }
  0x62   : > { %p3099_p12 = pneg %p3098_p1 }
  0x64   : > { %p3106_p8 = pnand %p3105_p6, %p3099_p12 }
  0x66   : > { %3109 = shalt.err (!%p3106_p8)
}
  0x67   : > { %2829 = dma.hbm_to_vmem [thread:$0]  (!%p3446_p13), %s3971_s5, 2048, %s293_s30, [#allocation17], %s3300_s18, %s3300_s18, %s3301_s3  }
  0x68   : > { %s3123_s21 = scalar_lea.vmem %s3524_s12, 256  ;;  %p4014_p9 = pneg %p3500_p4 }
  0x69   : > { %p3124_p0 = scmp.ne.s32.totalorder %s3524_s12, %s3123_s21  ;;  %s3304_s26 = smov [#allocation15]  }
  0x6a   : > { %s3128_s17 = sshll.u32 %s3304_s26, 4  ;;  %s3129_s17 = int_to_ptr.vmem [resolvable:$false] %s3128_s17 }
  0x6b   : > { %p3126_p10 = pnand %p3124_p0, %p4014_p9  ;;  %s3130_s25 = scalar_lea.vmem %s3129_s17, 512 }
  0x6c   : > { %p3131_p12 = scmp.lt.s32.totalorder %s3524_s12, %s3129_s17  ;;  %p3132_p5 = scmp.lt.s32.totalorder %s3130_s25, %s3123_s21 }
  0x6d   : > { %p3127_p1 = pneg %p3126_p10 }
  0x6e   : > { %p3133_p2 = por %p3132_p5, %p3131_p12 }
  0x70   : > { %p3134_p6 = pnand %p3133_p2, %p3127_p1 }
  0x72   : > { %3137 = shalt.err (!%p3134_p6)
}
  0x73   : > { %2836 = dma.hbm_to_vmem [thread:$0]  (!%p3500_p4), %s3522_s11, 256, %s3524_s12, %s3504_s23, %s3300_s18, %s3300_s18, %s3301_s3  }
  0x74   : > { %354 = sbr.rel (%p3438_p11) target bundleno = 1572 (0x624), region = 48  ;;  %p4015_p13 = scmp.eq.s32.totalorder (!%p3438_p11), %s3409_s16, 0 }
  0x79   : > { %3233 = dma.done.wait (%p4015_p13), [#allocation11], 2048   ;;  %p4016_p8 = pmov %p4015_p13 }
  0x7a   : > { %s360_s30 = sand.u32 1, %s3409_s16   ;;  %s362_s27 = sand.u32 1, %s3270_s9  }
  0x7b   : > { %3235 = vsyncadd (%p4016_p8), [#allocation11], 4294965248  ;;  %s3570_s24 = sshll.u32 %s362_s27, 4  ;;  %s361_s7 = scalar_lea.sflag [#allocation14], %s360_s30 }
  0x7c   : > { %s3573_s6 = scalar_lea.vmem [#allocation13], %s3570_s24 }
  0x7d   : > { %3237 = dma.done.wait (%p3419_p3), %s361_s7, 512  }
  0x7e   : > { %3239 = vsyncadd (%p3419_p3), %s361_s7, 4294966784  ;;  %s373_s22 = scalar_lea.vmem [#allocation15], %s3570_s24  ;;  %p4017_p11 = pmov %p4016_p8 }
  0x7f   : > { %p4018_p4 = pmov %p4016_p8 }
  0x80   : > { %3241 = dma.done.wait (%p4017_p11), [#allocation17], 10240  }
  0x81   : > { %3243 = vsyncadd (%p4018_p4), [#allocation17], 4294957056  ;;  %s4019_s23 = sld [smem:[#allocation30_spill]]  ;;  %s416_s3 = sand.u32 1, %s3258_s28  }
  0x82   : > { %s4020_s18 = sld [smem:[#allocation29_spill]]  ;;  %s2504_s11 = sshll.u32 %s416_s3, 4 }
  0x83   : > { %s3589_s19 = scalar_lea.vmem [#allocation20], %s2504_s11 }
  0x87   : > { %p423_p0 = scmp.eq.s32.totalorder %s4019_s23, 0 }
  0x88   : > { %p424_p9 = scmp.eq.s32.totalorder %s4020_s18, 0 }
  0x8a   : > { %p425_p10 = pnand %p424_p9, %p423_p0 }
  0x8b   : > { %s4021_s4 = sld [smem:[#allocation39_spill]] (!%p425_p10) }
  0x8c   : > { %428 = sbr.rel (%p425_p10) target bundleno = 437 (0x1b5), region = 72 }
  0x91   : > { %v506_v0 = vld [vmem:[#allocation16 + $0x1e8] sm:$0xff]  ;;  %v508_v1 = vld [vmem:[#allocation16 + $0x1f8] sm:$0xff]  ;;  %v505_v2 = vld [vmem:[#allocation16 + $0x1e0] sm:$0xff]  ;;  %v3305_v6 = vmov 0.0  }
  0x92   : > { %531 = vmatprep.subr.mxu0 %v506_v0  ;;  %692 = vmatprep.subr.mxu1 %v508_v1  ;;  %v507_v3 = vld [vmem:[#allocation16 + $0x1f0] sm:$0xff]  ;;  %v502_v4 = vld [vmem:[#allocation16 + $0x1c8] sm:$0xff]  ;;  %v504_v5 = vld [vmem:[#allocation16 + $0x1d8] sm:$0xff]  ;;  %917 = vst [vmem:[#allocation4 + $0x30] sm:$0xff] %v3305_v6 }
  0x93   : > { %918 = vst [vmem:[#allocation4 + $0x38] sm:$0xff] %v3305_v6  ;;  %919 = vst [vmem:[#allocation4 + $0x40] sm:$0xff] %v3305_v6  ;;  %532 = vmatpush1.msra.mxu0 %v505_v2  ;;  %693 = vmatpush1.msra.mxu1 %v507_v3  ;;  %v501_v7 = vld [vmem:[#allocation16 + $0x1c0] sm:$0xff]  ;;  %v503_v8 = vld [vmem:[#allocation16 + $0x1d0] sm:$0xff] }
  0x94   : > { %920 = vst [vmem:[#allocation4 + $0x10] sm:$0xff] %v3305_v6  ;;  %921 = vst [vmem:[#allocation4 + $0x28] sm:$0xff] %v3305_v6  ;;  %v498_v9 = vld [vmem:[#allocation16 + $0x1a8] sm:$0xff]  ;;  %533 = vmatprep.subr.mxu0 %v502_v4  ;;  %694 = vmatprep.subr.mxu1 %v504_v5  ;;  %v500_v10 = vld [vmem:[#allocation16 + $0x1b8] sm:$0xff] }
  0x95   : > { %922 = vst [vmem:[#allocation4] sm:$0xff] %v3305_v6  ;;  %923 = vst [vmem:[#allocation4 + $0x50] sm:$0xff] %v3305_v6  ;;  %v497_v11 = vld [vmem:[#allocation16 + $0x1a0] sm:$0xff]  ;;  %v499_v12 = vld [vmem:[#allocation16 + $0x1b0] sm:$0xff]  ;;  %534 = vmatpush1.msra.mxu0 %v501_v7  ;;  %695 = vmatpush1.msra.mxu1 %v503_v8 }
  0x96   : > { %924 = vst [vmem:[#allocation4 + $0x68] sm:$0xff] %v3305_v6  ;;  %925 = vst [vmem:[#allocation4 + $0x8] sm:$0xff] %v3305_v6  ;;  %v494_v13 = vld [vmem:[#allocation16 + $0x188] sm:$0xff]  ;;  %v496_v14 = vld [vmem:[#allocation16 + $0x198] sm:$0xff]  ;;  %535 = vmatprep.subr.mxu0 %v498_v9  ;;  %696 = vmatprep.subr.mxu1 %v500_v10 }
  0x97   : > { %926 = vst [vmem:[#allocation4 + $0x60] sm:$0xff] %v3305_v6  ;;  %927 = vst [vmem:[#allocation4 + $0x78] sm:$0xff] %v3305_v6  ;;  %v493_v15 = vld [vmem:[#allocation16 + $0x180] sm:$0xff]  ;;  %v495_v16 = vld [vmem:[#allocation16 + $0x190] sm:$0xff]  ;;  %536 = vmatpush1.msra.mxu0 %v497_v11  ;;  %697 = vmatpush1.msra.mxu1 %v499_v12 }
  0x98   : > { %928 = vst [vmem:[#allocation4 + $0x20] sm:$0xff] %v3305_v6  ;;  %929 = vst [vmem:[#allocation4 + $0x48] sm:$0xff] %v3305_v6  ;;  %v490_v17 = vld [vmem:[#allocation16 + $0x168] sm:$0xff]  ;;  %v492_v18 = vld [vmem:[#allocation16 + $0x178] sm:$0xff]  ;;  %537 = vmatprep.subr.mxu0 %v494_v13  ;;  %698 = vmatprep.subr.mxu1 %v496_v14 }
  0x99   : > { %930 = vst [vmem:[#allocation4 + $0x58] sm:$0xff] %v3305_v6  ;;  %931 = vst [vmem:[#allocation4 + $0x70] sm:$0xff] %v3305_v6  ;;  %v489_v19 = vld [vmem:[#allocation16 + $0x160] sm:$0xff]  ;;  %v491_v20 = vld [vmem:[#allocation16 + $0x170] sm:$0xff]  ;;  %538 = vmatpush1.msra.mxu0 %v493_v15  ;;  %699 = vmatpush1.msra.mxu1 %v495_v16 }
  0x9a   : > { %932 = vst [vmem:[#allocation4 + $0x18] sm:$0xff] %v3305_v6  ;;  %933 = vst [vmem:[#allocation5 + $0x68] sm:$0xff] %v3305_v6  ;;  %v486_v21 = vld [vmem:[#allocation16 + $0x148] sm:$0xff]  ;;  %v488_v22 = vld [vmem:[#allocation16 + $0x158] sm:$0xff]  ;;  %539 = vmatprep.subr.mxu0 %v490_v17  ;;  %700 = vmatprep.subr.mxu1 %v492_v18  ;;  %v511_v18 = vlaneseq }
  0x9b   : > { %934 = vst [vmem:[#allocation5 + $0x10] sm:$0xff] %v3305_v6  ;;  %935 = vst [vmem:[#allocation5 + $0x30] sm:$0xff] %v3305_v6  ;;  %v485_v23 = vld [vmem:[#allocation16 + $0x140] sm:$0xff]  ;;  %v487_v24 = vld [vmem:[#allocation16 + $0x150] sm:$0xff]  ;;  %540 = vmatpush1.msra.mxu0 %v489_v19  ;;  %701 = vmatpush1.msra.mxu1 %v491_v20 }
  0x9c   : > { %936 = vst [vmem:[#allocation5 + $0x50] sm:$0xff] %v3305_v6  ;;  %937 = vst [vmem:[#allocation5 + $0x70] sm:$0xff] %v3305_v6  ;;  %v482_v25 = vld [vmem:[#allocation16 + $0x128] sm:$0xff]  ;;  %v484_v26 = vld [vmem:[#allocation16 + $0x138] sm:$0xff]  ;;  %541 = vmatprep.subr.mxu0 %v486_v21  ;;  %702 = vmatprep.subr.mxu1 %v488_v22  ;;  %v512_v19 = vshrl.u32 %v511_v18, 7 }
  0x9d   : > { %938 = vst [vmem:[#allocation5 + $0x18] sm:$0xff] %v3305_v6  ;;  %939 = vst [vmem:[#allocation5 + $0x58] sm:$0xff] %v3305_v6  ;;  %v481_v27 = vld [vmem:[#allocation16 + $0x120] sm:$0xff]  ;;  %v483_v28 = vld [vmem:[#allocation16 + $0x130] sm:$0xff]  ;;  %542 = vmatpush1.msra.mxu0 %v485_v23  ;;  %703 = vmatpush1.msra.mxu1 %v487_v24 }
  0x9e   : > { %940 = vst [vmem:[#allocation5 + $0x60] sm:$0xff] %v3305_v6  ;;  %941 = vst [vmem:[#allocation5 + $0x28] sm:$0xff] %v3305_v6  ;;  %v478_v29 = vld [vmem:[#allocation16 + $0x108] sm:$0xff]  ;;  %v480_v30 = vld [vmem:[#allocation16 + $0x118] sm:$0xff]  ;;  %543 = vmatprep.subr.mxu0 %v482_v25  ;;  %704 = vmatprep.subr.mxu1 %v484_v26  ;;  %v513_v20 = vsub.s32 0, %v512_v19  ;;  %v521_v21 = vsub.s32 2, %v512_v19 }
  0x9f   : > { %942 = vst [vmem:[#allocation5 + $0x20] sm:$0xff] %v3305_v6  ;;  %943 = vst [vmem:[#allocation5 + $0x8] sm:$0xff] %v3305_v6  ;;  %v477_v31 = vld [vmem:[#allocation16 + $0x100] sm:$0xff]  ;;  %v479_v32 = vld [vmem:[#allocation16 + $0x110] sm:$0xff]  ;;  %544 = vmatpush1.msra.mxu0 %v481_v27  ;;  %705 = vmatpush1.msra.mxu1 %v483_v28  ;;  %v517_v23 = vsub.s32 1, %v512_v19  ;;  %v525_v24 = vsub.s32 3, %v512_v19 }
  0xa0   : > { %944 = vst [vmem:[#allocation5 + $0x40] sm:$0xff] %v3305_v6  ;;  %945 = vst [vmem:[#allocation5 + $0x48] sm:$0xff] %v3305_v6  ;;  %v474_v33 = vld [vmem:[#allocation16 + $0xe8] sm:$0xff]  ;;  %v476_v34 = vld [vmem:[#allocation16 + $0xf8] sm:$0xff]  ;;  %545 = vmatprep.subr.mxu0 %v478_v29  ;;  %706 = vmatprep.subr.mxu1 %v480_v30 }
  0xa1   : > { %946 = vst [vmem:[#allocation5] sm:$0xff] %v3305_v6  ;;  %947 = vst [vmem:[#allocation5 + $0x78] sm:$0xff] %v3305_v6  ;;  %v473_v35 = vld [vmem:[#allocation16 + $0xe0] sm:$0xff]  ;;  %v475_v36 = vld [vmem:[#allocation16 + $0xf0] sm:$0xff]  ;;  %546 = vmatpush1.msra.mxu0 %v477_v31  ;;  %707 = vmatpush1.msra.mxu1 %v479_v32 }
  0xa2   : > { %948 = vst [vmem:[#allocation5 + $0x38] sm:$0xff] %v3305_v6  ;;  %949 = vst [vmem:[#allocation6] sm:$0x1] %v3305_v6  ;;  %v470_v37 = vld [vmem:[#allocation16 + $0xc8] sm:$0xff]  ;;  %v472_v38 = vld [vmem:[#allocation16 + $0xd8] sm:$0xff]  ;;  %547 = vmatprep.subr.mxu0 %v474_v33  ;;  %708 = vmatprep.subr.mxu1 %v476_v34 }
  0xa3   : > { %950 = vst [vmem:[#allocation7] sm:$0x1] %v3305_v6  ;;  %v469_v39 = vld [vmem:[#allocation16 + $0xc0] sm:$0xff]  ;;  %v471_v40 = vld [vmem:[#allocation16 + $0xd0] sm:$0xff]  ;;  %548 = vmatpush1.msra.mxu0 %v473_v35  ;;  %709 = vmatpush1.msra.mxu1 %v475_v36  ;;  %v466_v41 = vld [vmem:[#allocation16 + $0xa8] sm:$0xff] }
  0xa4   : > { %v468_v42 = vld [vmem:[#allocation16 + $0xb8] sm:$0xff]  ;;  %549 = vmatprep.subr.mxu0 %v470_v37  ;;  %710 = vmatprep.subr.mxu1 %v472_v38  ;;  %v465_v43 = vld [vmem:[#allocation16 + $0xa0] sm:$0xff]  ;;  %v467_v44 = vld [vmem:[#allocation16 + $0xb0] sm:$0xff] }
  0xa5   : > { %550 = vmatpush1.msra.mxu0 %v469_v39  ;;  %711 = vmatpush1.msra.mxu1 %v471_v40  ;;  %v462_v45 = vld [vmem:[#allocation16 + $0x88] sm:$0xff]  ;;  %v464_v46 = vld [vmem:[#allocation16 + $0x98] sm:$0xff]  ;;  %v461_v47 = vld [vmem:[#allocation16 + $0x80] sm:$0xff] }
  0xa6   : > { %551 = vmatprep.subr.mxu0 %v466_v41  ;;  %712 = vmatprep.subr.mxu1 %v468_v42  ;;  %v463_v48 = vld [vmem:[#allocation16 + $0x90] sm:$0xff]  ;;  %v458_v49 = vld [vmem:[#allocation16 + $0x68] sm:$0xff]  ;;  %v460_v50 = vld [vmem:[#allocation16 + $0x78] sm:$0xff] }
  0xa7   : > { %552 = vmatpush1.msra.mxu0 %v465_v43  ;;  %713 = vmatpush1.msra.mxu1 %v467_v44  ;;  %v457_v51 = vld [vmem:[#allocation16 + $0x60] sm:$0xff]  ;;  %v459_v52 = vld [vmem:[#allocation16 + $0x70] sm:$0xff]  ;;  %v454_v53 = vld [vmem:[#allocation16 + $0x48] sm:$0xff] }
  0xa8   : > { %553 = vmatprep.subr.mxu0 %v462_v45  ;;  %714 = vmatprep.subr.mxu1 %v464_v46  ;;  %v456_v54 = vld [vmem:[#allocation16 + $0x58] sm:$0xff]  ;;  %v453_v55 = vld [vmem:[#allocation16 + $0x40] sm:$0xff]  ;;  %v455_v56 = vld [vmem:[#allocation16 + $0x50] sm:$0xff] }
  0xa9   : > { %554 = vmatpush1.msra.mxu0 %v461_v47  ;;  %715 = vmatpush1.msra.mxu1 %v463_v48  ;;  %v450_v57 = vld [vmem:[#allocation16 + $0x28] sm:$0xff]  ;;  %v452_v58 = vld [vmem:[#allocation16 + $0x38] sm:$0xff]  ;;  %v449_v59 = vld [vmem:[#allocation16 + $0x20] sm:$0xff] }
  0xaa   : > { %555 = vmatprep.subr.mxu0 %v458_v49  ;;  %716 = vmatprep.subr.mxu1 %v460_v50  ;;  %v451_v60 = vld [vmem:[#allocation16 + $0x30] sm:$0xff]  ;;  %v446_v61 = vld [vmem:[#allocation16 + $0x8] sm:$0xff]  ;;  %v448_v62 = vld [vmem:[#allocation16 + $0x18] sm:$0xff] }
  0xab   : > { %556 = vmatpush1.msra.mxu0 %v457_v51  ;;  %717 = vmatpush1.msra.mxu1 %v459_v52  ;;  %v445_v63 = vld [vmem:[#allocation16] sm:$0xff]  ;;  %v447_v0 = vld [vmem:[#allocation16 + $0x10] sm:$0xff]  ;;  %v430_v2 = vld [vmem:[#allocation10 + $0x8] sm:$0xff] }
  0xac   : > { %557 = vmatprep.subr.mxu0 %v454_v53  ;;  %718 = vmatprep.subr.mxu1 %v456_v54  ;;  %v429_v1 = vld [vmem:[#allocation10] sm:$0xff]  ;;  %v431_v3 = vld [vmem:[#allocation10 + $0x10] sm:$0xff]  ;;  %v432_v4 = vld [vmem:[#allocation10 + $0x18] sm:$0xff] }
  0xad   : > { %558 = vmatpush1.msra.mxu0 %v453_v55  ;;  %719 = vmatpush1.msra.mxu1 %v455_v56  ;;  %v433_v5 = vld [vmem:[#allocation10 + $0x20] sm:$0xff]  ;;  %v434_v7 = vld [vmem:[#allocation10 + $0x28] sm:$0xff]  ;;  %v435_v8 = vld [vmem:[#allocation10 + $0x30] sm:$0xff] }
  0xae   : > { %559 = vmatprep.subr.mxu0 %v450_v57  ;;  %720 = vmatprep.subr.mxu1 %v452_v58  ;;  %v436_v9 = vld [vmem:[#allocation10 + $0x38] sm:$0xff]  ;;  %v437_v10 = vld [vmem:[#allocation10 + $0x40] sm:$0xff]  ;;  %v438_v11 = vld [vmem:[#allocation10 + $0x48] sm:$0xff] }
  0xaf   : > { %560 = vmatpush1.msra.mxu0 %v449_v59  ;;  %721 = vmatpush1.msra.mxu1 %v451_v60  ;;  %v439_v12 = vld [vmem:[#allocation10 + $0x50] sm:$0xff]  ;;  %v440_v13 = vld [vmem:[#allocation10 + $0x58] sm:$0xff]  ;;  %v441_v14 = vld [vmem:[#allocation10 + $0x60] sm:$0xff] }
  0xb0   : > { %561 = vmatprep.subr.mxu0 %v446_v61  ;;  %722 = vmatprep.subr.mxu1 %v448_v62  ;;  %v442_v15 = vld [vmem:[#allocation10 + $0x68] sm:$0xff]  ;;  %v443_v16 = vld [vmem:[#allocation10 + $0x70] sm:$0xff]  ;;  %v444_v17 = vld [vmem:[#allocation10 + $0x78] sm:$0xff] }
  0xb1   : > { %562 = vmatpush1.msra.mxu0 %v445_v63  ;;  %595 = vmatprep.mubr.f32.mxu0 %v3305_v6  ;;  %v509_v22 = vld [vmem:[%s4021_s4] sm:$0xf] }
  0xb2   : > { %723 = vmatpush1.msra.mxu1 %v447_v0  ;;  %756 = vmatprep.mubr.f32.mxu1 %v3305_v6  ;;  %v3660_v25 = vrot.slane %v509_v22, %v513_v20  ;;  %v3662_v26 = vrot.slane %v509_v22, %v521_v21  ;;  %v3664_v27 = vrot.slane %v509_v22, %v517_v23 }
  0xb3   : > { %596 = vmatmul.mubr.f32.vlgmr.msra.gmra.mxu0 %v429_v1  ;;  %757 = vmatmul.mubr.f32.vlgmr.msra.gmra.mxu1 %v429_v1 }
  0xb4   : > { %601 = vmatprep.mubr.f32.mxu0 %v3305_v6  ;;  %762 = vmatprep.mubr.f32.mxu1 %v3305_v6 }
  0xb7   : > { %602 = vmatmul.mubr.f32.gmra.mxu0 %v430_v2  ;;  %763 = vmatmul.mubr.f32.gmra.mxu1 %v430_v2 }
  0xb8   : > { %607 = vmatprep.mubr.f32.mxu0 %v3305_v6  ;;  %768 = vmatprep.mubr.f32.mxu1 %v3305_v6 }
  0xbb   : > { %608 = vmatmul.mubr.f32.gmra.mxu0 %v431_v3  ;;  %769 = vmatmul.mubr.f32.gmra.mxu1 %v431_v3 }
  0xbc   : > { %613 = vmatprep.mubr.f32.mxu0 %v3305_v6  ;;  %774 = vmatprep.mubr.f32.mxu1 %v3305_v6 }
  0xbf   : > { %614 = vmatmul.mubr.f32.gmra.mxu0 %v432_v4  ;;  %775 = vmatmul.mubr.f32.gmra.mxu1 %v432_v4 }
  0xc0   : > { %619 = vmatprep.mubr.f32.mxu0 %v3305_v6  ;;  %780 = vmatprep.mubr.f32.mxu1 %v3305_v6 }
  0xc3   : > { %620 = vmatmul.mubr.f32.gmra.mxu0 %v433_v5  ;;  %781 = vmatmul.mubr.f32.gmra.mxu1 %v433_v5 }
  0xc4   : > { %625 = vmatprep.mubr.f32.mxu0 %v3305_v6  ;;  %786 = vmatprep.mubr.f32.mxu1 %v3305_v6 }
  0xc7   : > { %626 = vmatmul.mubr.f32.gmra.mxu0 %v434_v7  ;;  %787 = vmatmul.mubr.f32.gmra.mxu1 %v434_v7 }
  0xc8   : > { %631 = vmatprep.mubr.f32.mxu0 %v3305_v6  ;;  %792 = vmatprep.mubr.f32.mxu1 %v3305_v6 }
  0xcb   : > { %632 = vmatmul.mubr.f32.gmra.mxu0 %v435_v8  ;;  %793 = vmatmul.mubr.f32.gmra.mxu1 %v435_v8 }
  0xcc   : > { %637 = vmatprep.mubr.f32.mxu0 %v3305_v6  ;;  %798 = vmatprep.mubr.f32.mxu1 %v3305_v6 }
  0xcf   : > { %638 = vmatmul.mubr.f32.gmra.mxu0 %v436_v9  ;;  %799 = vmatmul.mubr.f32.gmra.mxu1 %v436_v9 }
  0xd0   : > { %643 = vmatprep.mubr.f32.mxu0 %v3305_v6  ;;  %804 = vmatprep.mubr.f32.mxu1 %v3305_v6 }
  0xd3   : > { %644 = vmatmul.mubr.f32.gmra.mxu0 %v437_v10  ;;  %805 = vmatmul.mubr.f32.gmra.mxu1 %v437_v10 }
  0xd4   : > { %649 = vmatprep.mubr.f32.mxu0 %v3305_v6  ;;  %810 = vmatprep.mubr.f32.mxu1 %v3305_v6 }
  0xd7   : > { %650 = vmatmul.mubr.f32.gmra.mxu0 %v438_v11  ;;  %811 = vmatmul.mubr.f32.gmra.mxu1 %v438_v11 }
  0xd8   : > { %655 = vmatprep.mubr.f32.mxu0 %v3305_v6  ;;  %816 = vmatprep.mubr.f32.mxu1 %v3305_v6 }
  0xdb   : > { %656 = vmatmul.mubr.f32.gmra.mxu0 %v439_v12  ;;  %817 = vmatmul.mubr.f32.gmra.mxu1 %v439_v12 }
  0xdc   : > { %661 = vmatprep.mubr.f32.mxu0 %v3305_v6  ;;  %822 = vmatprep.mubr.f32.mxu1 %v3305_v6 }
  0xdf   : > { %662 = vmatmul.mubr.f32.gmra.mxu0 %v440_v13  ;;  %823 = vmatmul.mubr.f32.gmra.mxu1 %v440_v13 }
  0xe0   : > { %667 = vmatprep.mubr.f32.mxu0 %v3305_v6  ;;  %828 = vmatprep.mubr.f32.mxu1 %v3305_v6 }
  0xe3   : > { %668 = vmatmul.mubr.f32.gmra.mxu0 %v441_v14  ;;  %829 = vmatmul.mubr.f32.gmra.mxu1 %v441_v14 }
  0xe4   : > { %673 = vmatprep.mubr.f32.mxu0 %v3305_v6  ;;  %834 = vmatprep.mubr.f32.mxu1 %v3305_v6 }
  0xe7   : > { %674 = vmatmul.mubr.f32.gmra.mxu0 %v442_v15  ;;  %835 = vmatmul.mubr.f32.gmra.mxu1 %v442_v15 }
  0xe8   : > { %679 = vmatprep.mubr.f32.mxu0 %v3305_v6  ;;  %840 = vmatprep.mubr.f32.mxu1 %v3305_v6 }
  0xeb   : > { %680 = vmatmul.mubr.f32.gmra.mxu0 %v443_v16  ;;  %841 = vmatmul.mubr.f32.gmra.mxu1 %v443_v16 }
  0xec   : > { %685 = vmatprep.mubr.f32.mxu0 %v3305_v6  ;;  %846 = vmatprep.mubr.f32.mxu1 %v3305_v6  ;;  %v3666_v6 = vrot.slane %v509_v22, %v525_v24 }
  0xef   : > { %686 = vmatmul.mubr.f32.gmra.mxu0 %v444_v17  ;;  %847 = vmatmul.mubr.f32.gmra.mxu1 %v444_v17 }
 0x173   : > { %v597_v28 = vpop.f32.mrf.mxu0  ;;  %v758_v29 = vpop.f32.mrf.mxu1 }
 0x174   : > { %v598_v30 = vadd.f32 %v597_v28, %v3660_v25  ;;  %v759_v31 = vadd.f32 %v758_v29, %v3662_v26 }
 0x175   : > { %v599_v32 = vpop.f32.mrf.mxu0  ;;  %v760_v33 = vpop.f32.mrf.mxu1 }
 0x176   : > { %853 = vst [vmem:[#allocation2 + $0xb0] sm:$0xff] %v598_v30  ;;  %885 = vst [vmem:[#allocation3 + $0x80] sm:$0xff] %v759_v31  ;;  %v600_v34 = vadd.f32 %v599_v32, %v3664_v27  ;;  %v761_v35 = vadd.f32 %v760_v33, %v3666_v6 }
 0x177   : > { %v603_v36 = vpop.f32.mrf.mxu0  ;;  %v764_v37 = vpop.f32.mrf.mxu1 }
 0x178   : > { %854 = vst [vmem:[#allocation2] sm:$0xff] %v600_v34  ;;  %901 = vst [vmem:[#allocation3 + $0x10] sm:$0xff] %v761_v35  ;;  %v604_v38 = vadd.f32 %v603_v36, %v3660_v25  ;;  %v765_v39 = vadd.f32 %v764_v37, %v3662_v26 }
 0x179   : > { %v605_v40 = vpop.f32.mrf.mxu0  ;;  %v766_v41 = vpop.f32.mrf.mxu1 }
 0x17a   : > { %855 = vst [vmem:[#allocation2 + $0xd8] sm:$0xff] %v604_v38  ;;  %886 = vst [vmem:[#allocation3 + $0xc8] sm:$0xff] %v765_v39  ;;  %v606_v42 = vadd.f32 %v605_v40, %v3664_v27  ;;  %v767_v43 = vadd.f32 %v766_v41, %v3666_v6 }
 0x17b   : > { %v609_v44 = vpop.f32.mrf.mxu0  ;;  %v770_v45 = vpop.f32.mrf.mxu1 }
 0x17c   : > { %856 = vst [vmem:[#allocation2 + $0x18] sm:$0xff] %v606_v42  ;;  %902 = vst [vmem:[#allocation3 + $0x70] sm:$0xff] %v767_v43  ;;  %v610_v46 = vadd.f32 %v609_v44, %v3660_v25  ;;  %v771_v47 = vadd.f32 %v770_v45, %v3662_v26 }
 0x17d   : > { %v611_v48 = vpop.f32.mrf.mxu0  ;;  %v772_v49 = vpop.f32.mrf.mxu1 }
 0x17e   : > { %857 = vst [vmem:[#allocation2 + $0x50] sm:$0xff] %v610_v46  ;;  %887 = vst [vmem:[#allocation3 + $0xe8] sm:$0xff] %v771_v47  ;;  %v612_v50 = vadd.f32 %v611_v48, %v3664_v27  ;;  %v773_v51 = vadd.f32 %v772_v49, %v3666_v6 }
 0x17f   : > { %v615_v52 = vpop.f32.mrf.mxu0  ;;  %v776_v53 = vpop.f32.mrf.mxu1 }
 0x180   : > { %858 = vst [vmem:[#allocation2 + $0x68] sm:$0xff] %v612_v50  ;;  %903 = vst [vmem:[#allocation3 + $0x50] sm:$0xff] %v773_v51  ;;  %v616_v54 = vadd.f32 %v615_v52, %v3660_v25  ;;  %v777_v55 = vadd.f32 %v776_v53, %v3662_v26 }
 0x181   : > { %v617_v56 = vpop.f32.mrf.mxu0  ;;  %v778_v57 = vpop.f32.mrf.mxu1 }
 0x182   : > { %859 = vst [vmem:[#allocation2 + $0x30] sm:$0xff] %v616_v54  ;;  %888 = vst [vmem:[#allocation3 + $0x78] sm:$0xff] %v777_v55  ;;  %v618_v58 = vadd.f32 %v617_v56, %v3664_v27  ;;  %v779_v59 = vadd.f32 %v778_v57, %v3666_v6 }
 0x183   : > { %v621_v60 = vpop.f32.mrf.mxu0  ;;  %v782_v61 = vpop.f32.mrf.mxu1 }
 0x184   : > { %860 = vst [vmem:[#allocation2 + $0x48] sm:$0xff] %v618_v58  ;;  %904 = vst [vmem:[#allocation3 + $0xa0] sm:$0xff] %v779_v59  ;;  %v622_v62 = vadd.f32 %v621_v60, %v3660_v25  ;;  %v783_v63 = vadd.f32 %v782_v61, %v3662_v26 }
 0x185   : > { %v623_v0 = vpop.f32.mrf.mxu0  ;;  %v784_v1 = vpop.f32.mrf.mxu1 }
 0x186   : > { %861 = vst [vmem:[#allocation2 + $0x80] sm:$0xff] %v622_v62  ;;  %889 = vst [vmem:[#allocation3 + $0x8] sm:$0xff] %v783_v63  ;;  %v624_v2 = vadd.f32 %v623_v0, %v3664_v27  ;;  %v785_v3 = vadd.f32 %v784_v1, %v3666_v6 }
 0x187   : > { %v627_v4 = vpop.f32.mrf.mxu0  ;;  %v788_v5 = vpop.f32.mrf.mxu1 }
 0x188   : > { %862 = vst [vmem:[#allocation2 + $0x88] sm:$0xff] %v624_v2  ;;  %905 = vst [vmem:[#allocation3 + $0xd8] sm:$0xff] %v785_v3  ;;  %v628_v7 = vadd.f32 %v627_v4, %v3660_v25  ;;  %v789_v8 = vadd.f32 %v788_v5, %v3662_v26 }
 0x189   : > { %v629_v9 = vpop.f32.mrf.mxu0  ;;  %v790_v10 = vpop.f32.mrf.mxu1 }
 0x18a   : > { %863 = vst [vmem:[#allocation2 + $0xe8] sm:$0xff] %v628_v7  ;;  %890 = vst [vmem:[#allocation3 + $0x90] sm:$0xff] %v789_v8  ;;  %v630_v11 = vadd.f32 %v629_v9, %v3664_v27  ;;  %v791_v12 = vadd.f32 %v790_v10, %v3666_v6 }
 0x18b   : > { %v633_v13 = vpop.f32.mrf.mxu0  ;;  %v794_v14 = vpop.f32.mrf.mxu1 }
 0x18c   : > { %864 = vst [vmem:[#allocation2 + $0xb8] sm:$0xff] %v630_v11  ;;  %906 = vst [vmem:[#allocation3 + $0x30] sm:$0xff] %v791_v12  ;;  %v634_v15 = vadd.f32 %v633_v13, %v3660_v25  ;;  %v795_v16 = vadd.f32 %v794_v14, %v3662_v26 }
 0x18d   : > { %v635_v17 = vpop.f32.mrf.mxu0  ;;  %v796_v18 = vpop.f32.mrf.mxu1 }
 0x18e   : > { %865 = vst [vmem:[#allocation2 + $0x60] sm:$0xff] %v634_v15  ;;  %891 = vst [vmem:[#allocation3 + $0x58] sm:$0xff] %v795_v16  ;;  %v636_v19 = vadd.f32 %v635_v17, %v3664_v27  ;;  %v797_v20 = vadd.f32 %v796_v18, %v3666_v6 }
 0x18f   : > { %v639_v21 = vpop.f32.mrf.mxu0  ;;  %v800_v22 = vpop.f32.mrf.mxu1 }
 0x190   : > { %866 = vst [vmem:[#allocation2 + $0xf0] sm:$0xff] %v636_v19  ;;  %907 = vst [vmem:[#allocation3 + $0x20] sm:$0xff] %v797_v20  ;;  %v640_v23 = vadd.f32 %v639_v21, %v3660_v25  ;;  %v801_v24 = vadd.f32 %v800_v22, %v3662_v26 }
 0x191   : > { %v641_v28 = vpop.f32.mrf.mxu0  ;;  %v802_v29 = vpop.f32.mrf.mxu1 }
 0x192   : > { %867 = vst [vmem:[#allocation2 + $0x8] sm:$0xff] %v640_v23  ;;  %892 = vst [vmem:[#allocation3 + $0xa8] sm:$0xff] %v801_v24  ;;  %v642_v30 = vadd.f32 %v641_v28, %v3664_v27  ;;  %v803_v31 = vadd.f32 %v802_v29, %v3666_v6 }
 0x193   : > { %v645_v32 = vpop.f32.mrf.mxu0  ;;  %v806_v33 = vpop.f32.mrf.mxu1 }
 0x194   : > { %868 = vst [vmem:[#allocation2 + $0x78] sm:$0xff] %v642_v30  ;;  %908 = vst [vmem:[#allocation3 + $0xf0] sm:$0xff] %v803_v31  ;;  %v646_v34 = vadd.f32 %v645_v32, %v3660_v25  ;;  %v807_v35 = vadd.f32 %v806_v33, %v3662_v26 }
 0x195   : > { %v647_v36 = vpop.f32.mrf.mxu0  ;;  %v808_v37 = vpop.f32.mrf.mxu1 }
 0x196   : > { %869 = vst [vmem:[#allocation2 + $0x38] sm:$0xff] %v646_v34  ;;  %893 = vst [vmem:[#allocation3 + $0xd0] sm:$0xff] %v807_v35  ;;  %v648_v38 = vadd.f32 %v647_v36, %v3664_v27  ;;  %v809_v39 = vadd.f32 %v808_v37, %v3666_v6 }
 0x197   : > { %v651_v40 = vpop.f32.mrf.mxu0  ;;  %v812_v41 = vpop.f32.mrf.mxu1 }
 0x198   : > { %870 = vst [vmem:[#allocation2 + $0x58] sm:$0xff] %v648_v38  ;;  %909 = vst [vmem:[#allocation3 + $0x88] sm:$0xff] %v809_v39  ;;  %v652_v42 = vadd.f32 %v651_v40, %v3660_v25  ;;  %v813_v43 = vadd.f32 %v812_v41, %v3662_v26 }
 0x199   : > { %v653_v44 = vpop.f32.mrf.mxu0  ;;  %v814_v45 = vpop.f32.mrf.mxu1 }
 0x19a   : > { %871 = vst [vmem:[#allocation2 + $0x40] sm:$0xff] %v652_v42  ;;  %894 = vst [vmem:[#allocation3 + $0xb0] sm:$0xff] %v813_v43  ;;  %v654_v46 = vadd.f32 %v653_v44, %v3664_v27  ;;  %v815_v47 = vadd.f32 %v814_v45, %v3666_v6 }
 0x19b   : > { %v657_v48 = vpop.f32.mrf.mxu0  ;;  %v818_v49 = vpop.f32.mrf.mxu1 }
 0x19c   : > { %872 = vst [vmem:[#allocation2 + $0xc8] sm:$0xff] %v654_v46  ;;  %910 = vst [vmem:[#allocation3 + $0x48] sm:$0xff] %v815_v47  ;;  %v658_v50 = vadd.f32 %v657_v48, %v3660_v25  ;;  %v819_v51 = vadd.f32 %v818_v49, %v3662_v26 }
 0x19d   : > { %v659_v52 = vpop.f32.mrf.mxu0  ;;  %v820_v53 = vpop.f32.mrf.mxu1 }
 0x19e   : > { %873 = vst [vmem:[#allocation2 + $0xe0] sm:$0xff] %v658_v50  ;;  %895 = vst [vmem:[#allocation3 + $0x38] sm:$0xff] %v819_v51  ;;  %v660_v54 = vadd.f32 %v659_v52, %v3664_v27  ;;  %v821_v55 = vadd.f32 %v820_v53, %v3666_v6 }
 0x19f   : > { %v663_v56 = vpop.f32.mrf.mxu0  ;;  %v824_v57 = vpop.f32.mrf.mxu1 }
 0x1a0   : > { %874 = vst [vmem:[#allocation2 + $0x90] sm:$0xff] %v660_v54  ;;  %911 = vst [vmem:[#allocation3 + $0xf8] sm:$0xff] %v821_v55  ;;  %v664_v58 = vadd.f32 %v663_v56, %v3660_v25  ;;  %v825_v59 = vadd.f32 %v824_v57, %v3662_v26 }
 0x1a1   : > { %v665_v60 = vpop.f32.mrf.mxu0  ;;  %v826_v61 = vpop.f32.mrf.mxu1 }
 0x1a2   : > { %875 = vst [vmem:[#allocation2 + $0x70] sm:$0xff] %v664_v58  ;;  %896 = vst [vmem:[#allocation3 + $0x40] sm:$0xff] %v825_v59  ;;  %v666_v62 = vadd.f32 %v665_v60, %v3664_v27  ;;  %v827_v63 = vadd.f32 %v826_v61, %v3666_v6 }
 0x1a3   : > { %v669_v0 = vpop.f32.mrf.mxu0  ;;  %v830_v1 = vpop.f32.mrf.mxu1 }
 0x1a4   : > { %876 = vst [vmem:[#allocation2 + $0xc0] sm:$0xff] %v666_v62  ;;  %912 = vst [vmem:[#allocation3 + $0xc0] sm:$0xff] %v827_v63  ;;  %v670_v2 = vadd.f32 %v669_v0, %v3660_v25  ;;  %v831_v3 = vadd.f32 %v830_v1, %v3662_v26 }
 0x1a5   : > { %v671_v4 = vpop.f32.mrf.mxu0  ;;  %v832_v5 = vpop.f32.mrf.mxu1 }
 0x1a6   : > { %877 = vst [vmem:[#allocation2 + $0xa8] sm:$0xff] %v670_v2  ;;  %897 = vst [vmem:[#allocation3 + $0xe0] sm:$0xff] %v831_v3  ;;  %v672_v7 = vadd.f32 %v671_v4, %v3664_v27  ;;  %v833_v8 = vadd.f32 %v832_v5, %v3666_v6 }
 0x1a7   : > { %v675_v9 = vpop.f32.mrf.mxu0  ;;  %v836_v10 = vpop.f32.mrf.mxu1 }
 0x1a8   : > { %878 = vst [vmem:[#allocation2 + $0xd0] sm:$0xff] %v672_v7  ;;  %913 = vst [vmem:[#allocation3 + $0xb8] sm:$0xff] %v833_v8  ;;  %v676_v11 = vadd.f32 %v675_v9, %v3660_v25  ;;  %v837_v12 = vadd.f32 %v836_v10, %v3662_v26 }
 0x1a9   : > { %v677_v13 = vpop.f32.mrf.mxu0  ;;  %v838_v14 = vpop.f32.mrf.mxu1 }
 0x1aa   : > { %879 = vst [vmem:[#allocation2 + $0x10] sm:$0xff] %v676_v11  ;;  %898 = vst [vmem:[#allocation3 + $0x60] sm:$0xff] %v837_v12  ;;  %v678_v15 = vadd.f32 %v677_v13, %v3664_v27  ;;  %v839_v16 = vadd.f32 %v838_v14, %v3666_v6 }
 0x1ab   : > { %v681_v17 = vpop.f32.mrf.mxu0  ;;  %v842_v18 = vpop.f32.mrf.mxu1 }
 0x1ac   : > { %880 = vst [vmem:[#allocation2 + $0x28] sm:$0xff] %v678_v15  ;;  %914 = vst [vmem:[#allocation3] sm:$0xff] %v839_v16  ;;  %v682_v19 = vadd.f32 %v681_v17, %v3660_v25  ;;  %v843_v20 = vadd.f32 %v842_v18, %v3662_v26 }
 0x1ad   : > { %v683_v21 = vpop.f32.mrf.mxu0  ;;  %v844_v22 = vpop.f32.mrf.mxu1 }
 0x1ae   : > { %881 = vst [vmem:[#allocation2 + $0xa0] sm:$0xff] %v682_v19  ;;  %899 = vst [vmem:[#allocation3 + $0x18] sm:$0xff] %v843_v20  ;;  %v684_v23 = vadd.f32 %v683_v21, %v3664_v27  ;;  %v845_v24 = vadd.f32 %v844_v22, %v3666_v6 }
 0x1af   : > { %v687_v28 = vpop.f32.mrf.mxu0  ;;  %v848_v29 = vpop.f32.mrf.mxu1 }
 0x1b0   : > { %882 = vst [vmem:[#allocation2 + $0xf8] sm:$0xff] %v684_v23  ;;  %915 = vst [vmem:[#allocation3 + $0x28] sm:$0xff] %v845_v24  ;;  %v688_v30 = vadd.f32 %v687_v28, %v3660_v25  ;;  %v849_v31 = vadd.f32 %v848_v29, %v3662_v26 }
 0x1b1   : > { %v689_v32 = vpop.f32.mrf.mxu0  ;;  %v850_v33 = vpop.f32.mrf.mxu1 }
 0x1b2   : > { %883 = vst [vmem:[#allocation2 + $0x20] sm:$0xff] %v688_v30  ;;  %900 = vst [vmem:[#allocation3 + $0x68] sm:$0xff] %v849_v31  ;;  %v690_v34 = vadd.f32 %v689_v32, %v3664_v27  ;;  %v851_v35 = vadd.f32 %v850_v33, %v3666_v6 }
 0x1b4   : > { %884 = vst [vmem:[#allocation2 + $0x98] sm:$0xff] %v690_v34  ;;  %916 = vst [vmem:[#allocation3 + $0x98] sm:$0xff] %v851_v35 }
 0x1b5 PF: > { %s4022_s14 = sld [smem:[#allocation29_spill]]  ;;  %v3734_v36 = vld [vmem:[%s373_s22] sm:$0xff]  ;;  %v3738_v25 = vld [vmem:[%s373_s22 + $0x8] sm:$0xff] }
 0x1b6   : > { %v953_v26 = vunpack.c.l.bf16 %v3734_v36  ;;  %v3743_v37 = vunpack.c.h.bf16 %v3734_v36  ;;  %v955_v27 = vunpack.c.l.bf16 %v3738_v25  ;;  %v3747_v6 = vunpack.c.h.bf16 %v3738_v25  ;;  %s4023_s20 = sld [smem:[#allocation30_spill]] }
 0x1bb   : > { %s2505_s10 = sshll.u32 %s4022_s14, 4 }
 0x1bc   : > { %p2506_p3 = scmp.ne.s32.totalorder %s4023_s20, 0 }
 0x1bd   : > { %s4025_s25 = sld [smem:[#allocation40_spill]] (!%p2506_p3)  ;;  %s1180_s30 = scalar_lea.vmem (!%p2506_p3), [#allocation9], %s2505_s10 }
 0x1be   : > { %960 = sbr.rel (%p2506_p3) target bundleno = 938 (0x3aa), region = 76 }
 0x1c3   : > { %v978_v38 = vld [vmem:[#allocation18 + $0x78] sm:$0xff]  ;;  %v1076_v40 = vld [vmem:[#allocation3 + $0x68] sm:$0xff]  ;;  %1157 = vmatprep.mubr.f32.mxu1 %v3743_v37  ;;  %1199 = vxpose.xlu0.b32.start [1/2] (short) %v3743_v37, 128  ;;  %v977_v41 = vld [vmem:[#allocation18 + $0x70] sm:$0xff]  ;;  %vm1231_vm0 = vcmask 130048  }
 0x1c4   : > { %v1092_v39 = vld [vmem:[#allocation3 + $0x98] sm:$0xff]  ;;  %2668 = vmatprep.subr.mxu0 %v978_v38  ;;  %v1091_v42 = vld [vmem:[#allocation3 + $0x28] sm:$0xff]  ;;  %v1090_v45 = vld [vmem:[#allocation3] sm:$0xff] }
 0x1c5   : > { %2576 = vmatprep.subr.mxu1 %v1092_v39  ;;  %v1075_v43 = vld [vmem:[#allocation3 + $0x18] sm:$0xff]  ;;  %2669 = vmatpush3.msra.mxu0 %v978_v38  ;;  %v976_v44 = vld [vmem:[#allocation18 + $0x68] sm:$0xff]  ;;  %v1074_v46 = vld [vmem:[#allocation3 + $0x60] sm:$0xff] }
 0x1c6   : > { %2577 = vmatpush3.msra.mxu1 %v1076_v40  ;;  %2670 = vmatprep.subr.mxu0 %v977_v41  ;;  %v975_v47 = vld [vmem:[#allocation18 + $0x60] sm:$0xff]  ;;  %v1089_v48 = vld [vmem:[#allocation3 + $0xb8] sm:$0xff]  ;;  %v972_v56 = vld [vmem:[#allocation18 + $0x48] sm:$0xff] }
 0x1c7   : > { %2578 = vmatprep.subr.mxu1 %v1091_v42  ;;  %2671 = vmatpush3.msra.mxu0 %v977_v41  ;;  %v1073_v49 = vld [vmem:[#allocation3 + $0xe0] sm:$0xff]  ;;  %v973_v53 = vld [vmem:[#allocation18 + $0x50] sm:$0xff]  ;;  %v1086_v57 = vld [vmem:[#allocation3 + $0x48] sm:$0xff] }
 0x1c8   : > { %2579 = vmatpush3.msra.mxu1 %v1075_v43  ;;  %2672 = vmatprep.subr.mxu0 %v976_v44  ;;  %v974_v50 = vld [vmem:[#allocation18 + $0x58] sm:$0xff]  ;;  %v1070_v58 = vld [vmem:[#allocation3 + $0xb0] sm:$0xff]  ;;  %v971_v59 = vld [vmem:[#allocation18 + $0x40] sm:$0xff] }
 0x1c9   : > { %2580 = vmatprep.subr.mxu1 %v1090_v45  ;;  %2673 = vmatpush3.msra.mxu0 %v976_v44  ;;  %v1088_v51 = vld [vmem:[#allocation3 + $0xc0] sm:$0xff]  ;;  %v1087_v54 = vld [vmem:[#allocation3 + $0xf8] sm:$0xff]  ;;  %v1085_v60 = vld [vmem:[#allocation3 + $0x88] sm:$0xff] }
 0x1ca   : > { %2581 = vmatpush3.msra.mxu1 %v1074_v46  ;;  %2674 = vmatprep.subr.mxu0 %v975_v47  ;;  %v1072_v52 = vld [vmem:[#allocation3 + $0x40] sm:$0xff]  ;;  %v1071_v55 = vld [vmem:[#allocation3 + $0x38] sm:$0xff]  ;;  %v1069_v61 = vld [vmem:[#allocation3 + $0xd0] sm:$0xff] }
 0x1cb   : > { %2582 = vmatprep.subr.mxu1 %v1089_v48  ;;  %2675 = vmatpush3.msra.mxu0 %v975_v47  ;;  %v970_v62 = vld [vmem:[#allocation18 + $0x38] sm:$0xff]  ;;  %v1084_v63 = vld [vmem:[#allocation3 + $0xf0] sm:$0xff]  ;;  %v1068_v0 = vld [vmem:[#allocation3 + $0xa8] sm:$0xff] }
 0x1cc   : > { %2583 = vmatpush3.msra.mxu1 %v1073_v49  ;;  %2676 = vmatprep.subr.mxu0 %v974_v50  ;;  %v969_v1 = vld [vmem:[#allocation18 + $0x30] sm:$0xff]  ;;  %v1083_v2 = vld [vmem:[#allocation3 + $0x20] sm:$0xff]  ;;  %v968_v4 = vld [vmem:[#allocation18 + $0x28] sm:$0xff] }
 0x1cd   : > { %2584 = vmatprep.subr.mxu1 %v1088_v51  ;;  %2677 = vmatpush3.msra.mxu0 %v974_v50  ;;  %v1067_v3 = vld [vmem:[#allocation3 + $0x58] sm:$0xff]  ;;  %v1082_v5 = vld [vmem:[#allocation3 + $0x30] sm:$0xff]  ;;  %v967_v8 = vld [vmem:[#allocation18 + $0x20] sm:$0xff] }
 0x1ce   : > { %2585 = vmatpush3.msra.mxu1 %v1072_v52  ;;  %2678 = vmatprep.subr.mxu0 %v973_v53  ;;  %v1066_v7 = vld [vmem:[#allocation3 + $0x90] sm:$0xff]  ;;  %v1081_v9 = vld [vmem:[#allocation3 + $0xd8] sm:$0xff]  ;;  %v1065_v10 = vld [vmem:[#allocation3 + $0x8] sm:$0xff] }
 0x1cf   : > { %2586 = vmatprep.subr.mxu1 %v1087_v54  ;;  %2679 = vmatpush3.msra.mxu0 %v973_v53  ;;  %v966_v11 = vld [vmem:[#allocation18 + $0x18] sm:$0xff]  ;;  %v965_v14 = vld [vmem:[#allocation18 + $0x10] sm:$0xff]  ;;  %v1063_v16 = vld [vmem:[#allocation3 + $0xe8] sm:$0xff] }
 0x1d0   : > { %2587 = vmatpush3.msra.mxu1 %v1071_v55  ;;  %2680 = vmatprep.subr.mxu0 %v972_v56  ;;  %v1080_v12 = vld [vmem:[#allocation3 + $0xa0] sm:$0xff]  ;;  %v1064_v13 = vld [vmem:[#allocation3 + $0x78] sm:$0xff]  ;;  %v1079_v15 = vld [vmem:[#allocation3 + $0x50] sm:$0xff] }
 0x1d1   : > { %2588 = vmatprep.subr.mxu1 %v1086_v57  ;;  %2681 = vmatpush3.msra.mxu0 %v972_v56  ;;  %v964_v17 = vld [vmem:[#allocation18 + $0x8] sm:$0xff]  ;;  %v963_v20 = vld [vmem:[#allocation18] sm:$0xff]  ;;  %v2507_v42 = vld [vmem:[%s4025_s25] ss:$0 sm:$0xff] }
 0x1d2   : > { %2589 = vmatpush3.msra.mxu1 %v1070_v58  ;;  %2682 = vmatprep.subr.mxu0 %v971_v59  ;;  %v1078_v18 = vld [vmem:[#allocation3 + $0x70] sm:$0xff]  ;;  %v1062_v19 = vld [vmem:[#allocation3 + $0xc8] sm:$0xff]  ;;  %v1061_v23 = vld [vmem:[#allocation3 + $0x80] sm:$0xff] }
 0x1d3   : > { %2590 = vmatprep.subr.mxu1 %v1085_v60  ;;  %2683 = vmatpush3.msra.mxu0 %v971_v59  ;;  %v1077_v21 = vld [vmem:[#allocation3 + $0x10] sm:$0xff] }
 0x1d4   : > { %2591 = vmatpush3.msra.mxu1 %v1069_v61  ;;  %2684 = vmatprep.subr.mxu0 %v970_v62  ;;  %v961_v22 = vld [vmem:[%s3573_s6] sm:$0xff]  ;;  %v962_v24 = vld [vmem:[%s3573_s6 + $0x8] sm:$0xff] }
 0x1d5   : > { %2592 = vmatprep.subr.mxu1 %v1084_v63  ;;  %2685 = vmatpush3.msra.mxu0 %v970_v62 }
 0x1d6   : > { %2593 = vmatpush3.msra.mxu1 %v1068_v0  ;;  %2686 = vmatprep.subr.mxu0 %v969_v1 }
 0x1d7   : > { %2594 = vmatprep.subr.mxu1 %v1083_v2  ;;  %2687 = vmatpush3.msra.mxu0 %v969_v1 }
 0x1d8   : > { %2595 = vmatpush3.msra.mxu1 %v1067_v3  ;;  %2688 = vmatprep.subr.mxu0 %v968_v4 }
 0x1d9   : > { %2596 = vmatprep.subr.mxu1 %v1082_v5  ;;  %2689 = vmatpush3.msra.mxu0 %v968_v4  ;;  %v1457_v5 = vld [vmem:[#allocation6] sm:$0x1] }
 0x1da   : > { %2597 = vmatpush3.msra.mxu1 %v1066_v7  ;;  %2690 = vmatprep.subr.mxu0 %v967_v8 }
 0x1db   : > { %2598 = vmatprep.subr.mxu1 %v1081_v9  ;;  %2691 = vmatpush3.msra.mxu0 %v967_v8 }
 0x1dc   : > { %2599 = vmatpush3.msra.mxu1 %v1065_v10  ;;  %2692 = vmatprep.subr.mxu0 %v966_v11  ;;  %v1467_v10 = vld [vmem:[#allocation7] sm:$0x1] }
 0x1dd   : > { %2600 = vmatprep.subr.mxu1 %v1080_v12  ;;  %2693 = vmatpush3.msra.mxu0 %v966_v11 }
 0x1de   : > { %2601 = vmatpush3.msra.mxu1 %v1064_v13  ;;  %2694 = vmatprep.subr.mxu0 %v965_v14 }
 0x1df   : > { %2602 = vmatprep.subr.mxu1 %v1079_v15  ;;  %2695 = vmatpush3.msra.mxu0 %v965_v14 }
 0x1e0   : > { %2603 = vmatpush3.msra.mxu1 %v1063_v16  ;;  %2696 = vmatprep.subr.mxu0 %v964_v17 }
 0x1e1   : > { %2604 = vmatprep.subr.mxu1 %v1078_v18  ;;  %2697 = vmatpush3.msra.mxu0 %v964_v17 }
 0x1e2   : > { %2605 = vmatpush3.msra.mxu1 %v1062_v19  ;;  %2698 = vmatprep.subr.mxu0 %v963_v20 }
 0x1e3   : > { %2606 = vmatprep.subr.mxu1 %v1077_v21  ;;  %2699 = vmatpush3.msra.mxu0 %v963_v20 }
 0x1e4   : > { %2700 = vmatprep.mubr.f32.mxu0 %v961_v22  ;;  %2607 = vmatpush3.msra.mxu1 %v1061_v23 }
 0x1e5   : > { %2701 = vmatmul.mubr.f32.vlgmr.msra.gmra.mxu0 %v962_v24  ;;  %1158 = vmatmul.mubr.f32.vlgmr.msra.gmra.mxu1 %v953_v26  ;;  %v1184_v24 = vld [vmem:[#allocation4 + $0x38] sm:$0xff] }
 0x1e6   : > { %1200 = vxpose.xlu0.b32.end [2/2] (short) %v3747_v6, 128  ;;  %1162 = vmatprep.mubr.f32.mxu1 %v3747_v6 }
 0x1e9   : > { %1163 = vmatmul.mubr.f32.gmra.mxu1 %v955_v27 }
 0x25e   : > { %v1215_v28 = vpop.trf.xlu0 }
 0x25f   : > { %2707 = vmatprep.mubr.msk.f32.mxu0 %vm1231_vm0, %v1215_v28  ;;  %v1194_v28 = vld [vmem:[#allocation4 + $0x20] sm:$0xff] }
 0x262   : > { %v3761_v29 = vpop.trf.xlu0 }
 0x266   : > { %v3763_v30 = vpop.trf.xlu0 }
 0x26a   : > { %v3765_v31 = vpop.trf.xlu0 }
 0x26e   : > { %v3767_v32 = vpop.trf.xlu0 }
 0x272   : > { %v3769_v33 = vpop.trf.xlu0 }
 0x276   : > { %v3771_v34 = vpop.trf.xlu0 }
 0x27a   : > { %v3773_v35 = vpop.trf.xlu0 }
 0x27e   : > { %v3775_v38 = vpop.trf.xlu0 }
 0x282   : > { %v3777_v39 = vpop.trf.xlu0 }
 0x286   : > { %v1225_v40 = vpop.trf.xlu0 }
 0x287   : > { %2722 = vmatprep.mubr.msk.f32.mxu1 %vm1231_vm0, %v1225_v40 }
 0x28a   : > { %v1226_v17 = vpop.trf.xlu0 }
 0x28e   : > { %v1227_v18 = vpop.trf.xlu0 }
 0x292   : > { %v1228_v19 = vpop.trf.xlu0 }
 0x296   : > { %v1229_v22 = vpop.trf.xlu0 }
 0x29a   : > { %v1230_v23 = vpop.trf.xlu0 }
 0x2a5   : > { %v2702_v41 = vpop.f32.mrf.mxu0  ;;  %v2608_v43 = vpop.f32.mrf.mxu1 }
 0x2a6   : > { %v1058_v49 = vadd.f32 %v2702_v41, %v2507_v42 }
 0x2a7   : > { %v1052_v44 = vpop.f32.mrf.mxu0  ;;  %v2609_v46 = vpop.f32.mrf.mxu1 }
 0x2a8   : > { %v1053_v45 = vadd.f32 %v2507_v42, %v1052_v44  ;;  %v2610_v47 = vadd.f32 %v2609_v46, %v2608_v43  ;;  %v1196_v43 = vld [vmem:[#allocation4 + $0x58] sm:$0xff] }
 0x2a9   : > { %v2611_v48 = vpop.f32.mrf.mxu1 }
 0x2aa   : > { %v1160_v50 = vadd.f32 %v2610_v47, %v1053_v45  ;;  %v1185_v45 = vld [vmem:[#allocation4 + $0x40] sm:$0xff] }
 0x2ab   : > { %v2612_v51 = vpop.f32.mrf.mxu1 }
 0x2ac   : > { %v2508_v52 = vmul.f32 -1.442695, %v1160_v50  ;;  %1181 = vst [vmem:[%s1180_s30] sm:$0xff] %v1160_v50  ;;  %v2613_v53 = vadd.f32 %v2612_v51, %v2611_v48  ;;  %v1468_v55 = vmul.f32 %v1160_v50, %v1160_v50 }
 0x2ae   : > { %v1165_v54 = vadd.f32 %v2613_v53, %v1058_v49  ;;  %2952 = vpow2.f32 %v2508_v52  ;;  %v1198_v52 = vld [vmem:[#allocation4 + $0x18] sm:$0xff] }
 0x2b0   : > { %v2509_v56 = vmul.f32 -1.442695, %v1165_v54  ;;  %1182 = vst [vmem:[%s1180_s30 + $0x8] sm:$0xff] %v1165_v54  ;;  %v1458_v57 = vadd.f32 %v1165_v54, %v1160_v50  ;;  %v1469_v58 = vmul.f32 %v1165_v54, %v1165_v54  ;;  %v1188_v50 = vld [vmem:[#allocation4] sm:$0xff] }
 0x2b2   : > { %2954 = vpow2.f32 %v2509_v56  ;;  %v1459_v59 = vrot.slane %v1458_v57, 4  ;;  %v1470_v60 = vadd.f32 %v1469_v58, %v1468_v55  ;;  %v1187_v56 = vld [vmem:[#allocation4 + $0x28] sm:$0xff]  ;;  %v1197_v58 = vld [vmem:[#allocation4 + $0x70] sm:$0xff] }
 0x2b4   : > { %v1460_v61 = vadd.f32 %v1459_v59, %v1458_v57  ;;  %v1471_v62 = vrot.slane %v1470_v60, 4 }
 0x2b6   : > { %v1461_v63 = vrot.slane %v1460_v61, 2  ;;  %v1472_v0 = vadd.f32 %v1471_v62, %v1470_v60  ;;  %v1190_v62 = vld [vmem:[#allocation4 + $0x68] sm:$0xff] }
 0x2b8   : > { %v1462_v1 = vadd.f32 %v1461_v63, %v1460_v61  ;;  %v1473_v2 = vrot.slane %v1472_v0, 2 }
 0x2ba   : > { %v1463_v3 = vrot.slane %v1462_v1, 1  ;;  %v1474_v4 = vadd.f32 %v1473_v2, %v1472_v0 }
 0x2bb   : > { %v2953_v9 = vpop.eup %2952 }
 0x2bc   : > { %v1464_v7 = vadd.f32 %v1463_v3, %v1462_v1  ;;  %v1475_v8 = vrot.slane %v1474_v4, 1  ;;  %v1174_v14 = vadd.f32 1.0, %v2953_v9  ;;  %v1189_v3 = vld [vmem:[#allocation4 + $0x50] sm:$0xff] }
 0x2be   : > { %v1465_v11 = vadd.f32 %v1464_v7, %v1457_v5  ;;  %v1476_v12 = vadd.f32 %v1475_v8, %v1474_v4  ;;  %v1192_v7 = vld [vmem:[#allocation4 + $0x60] sm:$0xff] }
 0x2bf   : > { %v2955_v13 = vpop.eup %2954 }
 0x2c0   : > { %v1175_v15 = vadd.f32 1.0, %v2955_v13  ;;  %1466 = vst [vmem:[#allocation6] sm:$0x1] %v1465_v11  ;;  %v1477_v16 = vadd.f32 %v1476_v12, %v1467_v10  ;;  %v1191_v10 = vld [vmem:[#allocation4 + $0x8] sm:$0xff] }
 0x2c2   : > { %2956 = vrcp.f32 %v1175_v15  ;;  %1478 = vst [vmem:[#allocation7] sm:$0x1] %v1477_v16 }
 0x2c3   : > { %2958 = vrcp.f32 %v1174_v14 }
 0x2cf   : > { %v2957_v20 = vpop.eup %2956 }
 0x2d0   : > { %2703 = vmatprep.subr.mxu0 %v2957_v20  ;;  %2794 = vmatprep.subr.mxu1 %v2957_v20  ;;  %v2959_v21 = vpop.eup %2958 }
 0x2d1   : > { %2704 = vmatpush3.msra.mxu0 %v2957_v20  ;;  %2796 = vmatpush3.msra.mxu1 %v2957_v20 }
 0x2d2   : > { %2705 = vmatprep.subr.mxu0 %v2959_v21  ;;  %2795 = vmatprep.subr.mxu1 %v2959_v21 }
 0x2d3   : > { %2706 = vmatpush3.msra.mxu0 %v2959_v21  ;;  %2797 = vmatpush3.msra.mxu1 %v2959_v21 }
 0x2d4   : > { %2708 = vmatmul.mubr.msk.f32.vlgmr.msra.gmra.mxu0 %vm1231_vm0, %v3761_v29  ;;  %2723 = vmatmul.mubr.msk.f32.vlgmr.msra.gmra.mxu1 %vm1231_vm0, %v1226_v17 }
 0x2d5   : > { %2710 = vmatprep.mubr.msk.f32.mxu0 %vm1231_vm0, %v3763_v30  ;;  %2725 = vmatprep.mubr.msk.f32.mxu1 %vm1231_vm0, %v1227_v18 }
 0x2d8   : > { %2711 = vmatmul.mubr.msk.f32.gmra.mxu0 %vm1231_vm0, %v3765_v31  ;;  %2726 = vmatmul.mubr.msk.f32.gmra.mxu1 %vm1231_vm0, %v1228_v19  ;;  %v1183_v31 = vld [vmem:[#allocation4 + $0x30] sm:$0xff] }
 0x2d9   : > { %2713 = vmatprep.mubr.msk.f32.mxu0 %vm1231_vm0, %v3767_v32  ;;  %2728 = vmatprep.mubr.msk.f32.mxu1 %vm1231_vm0, %v1229_v22  ;;  %v1193_v32 = vld [vmem:[#allocation4 + $0x78] sm:$0xff] }
 0x2dc   : > { %2714 = vmatmul.mubr.msk.f32.gmra.mxu0 %vm1231_vm0, %v3769_v33  ;;  %2729 = vmatmul.mubr.msk.f32.gmra.mxu1 %vm1231_vm0, %v1230_v23 }
 0x2dd   : > { %2716 = vmatprep.mubr.msk.f32.mxu0 %vm1231_vm0, %v3771_v34  ;;  %v1186_v34 = vld [vmem:[#allocation4 + $0x10] sm:$0xff] }
 0x2e0   : > { %2717 = vmatmul.mubr.msk.f32.gmra.mxu0 %vm1231_vm0, %v3773_v35 }
 0x2e1   : > { %2719 = vmatprep.mubr.msk.f32.mxu0 %vm1231_vm0, %v3775_v38 }
 0x2e4   : > { %2720 = vmatmul.mubr.msk.f32.gmra.mxu0 %vm1231_vm0, %v3777_v39  ;;  %v1195_v39 = vld [vmem:[#allocation4 + $0x48] sm:$0xff] }
 0x394   : > { %v2709_v29 = vpop.f32.mrf.mxu0  ;;  %v2724_v30 = vpop.f32.mrf.mxu1 }
 0x395   : > { %v1426_v33 = vadd.f32 %v2709_v29, %v1184_v24  ;;  %v1436_v40 = vadd.f32 %v2724_v30, %v1194_v28 }
 0x396   : > { %v1346_v41 = vpop.f32.mrf.mxu0  ;;  %v1396_v42 = vpop.f32.mrf.mxu1 }
 0x397   : > { %1442 = vst [vmem:[#allocation4 + $0x38] sm:$0xff] %v1426_v33  ;;  %1452 = vst [vmem:[#allocation4 + $0x20] sm:$0xff] %v1436_v40  ;;  %v1425_v35 = vadd.f32 %v1346_v41, %v1183_v31  ;;  %v1435_v44 = vadd.f32 %v1396_v42, %v1193_v32 }
 0x398   : > { %v2712_v38 = vpop.f32.mrf.mxu0  ;;  %v2727_v46 = vpop.f32.mrf.mxu1 }
 0x399   : > { %1441 = vst [vmem:[#allocation4 + $0x30] sm:$0xff] %v1425_v35  ;;  %1451 = vst [vmem:[#allocation4 + $0x78] sm:$0xff] %v1435_v44  ;;  %v1428_v47 = vadd.f32 %v2712_v38, %v1186_v34  ;;  %v1438_v48 = vadd.f32 %v2727_v46, %v1196_v43 }
 0x39a   : > { %v1356_v49 = vpop.f32.mrf.mxu0  ;;  %v1406_v51 = vpop.f32.mrf.mxu1 }
 0x39b   : > { %1444 = vst [vmem:[#allocation4 + $0x10] sm:$0xff] %v1428_v47  ;;  %v1427_v53 = vadd.f32 %v1356_v49, %v1185_v45  ;;  %1454 = vst [vmem:[#allocation4 + $0x58] sm:$0xff] %v1438_v48  ;;  %v1437_v54 = vadd.f32 %v1406_v51, %v1195_v39 }
 0x39c   : > { %v2715_v55 = vpop.f32.mrf.mxu0  ;;  %v2730_v57 = vpop.f32.mrf.mxu1 }
 0x39d   : > { %1443 = vst [vmem:[#allocation4 + $0x40] sm:$0xff] %v1427_v53  ;;  %v1430_v59 = vadd.f32 %v2715_v55, %v1188_v50  ;;  %1453 = vst [vmem:[#allocation4 + $0x48] sm:$0xff] %v1437_v54  ;;  %v1440_v60 = vadd.f32 %v2730_v57, %v1198_v52 }
 0x39e   : > { %v1366_v61 = vpop.f32.mrf.mxu0  ;;  %v1416_v63 = vpop.f32.mrf.mxu1 }
 0x39f   : > { %1446 = vst [vmem:[#allocation4] sm:$0xff] %v1430_v59  ;;  %v1429_v0 = vadd.f32 %v1366_v61, %v1187_v56  ;;  %1456 = vst [vmem:[#allocation4 + $0x18] sm:$0xff] %v1440_v60  ;;  %v1439_v1 = vadd.f32 %v1416_v63, %v1197_v58 }
 0x3a0   : > { %v2718_v2 = vpop.f32.mrf.mxu0 }
 0x3a1   : > { %1445 = vst [vmem:[#allocation4 + $0x28] sm:$0xff] %v1429_v0  ;;  %v1432_v4 = vadd.f32 %v2718_v2, %v1190_v62  ;;  %1455 = vst [vmem:[#allocation4 + $0x70] sm:$0xff] %v1439_v1 }
 0x3a2   : > { %v1376_v5 = vpop.f32.mrf.mxu0 }
 0x3a3   : > { %1448 = vst [vmem:[#allocation4 + $0x68] sm:$0xff] %v1432_v4  ;;  %v1431_v8 = vadd.f32 %v1376_v5, %v1189_v3 }
 0x3a4   : > { %v2721_v9 = vpop.f32.mrf.mxu0 }
 0x3a5   : > { %1447 = vst [vmem:[#allocation4 + $0x50] sm:$0xff] %v1431_v8  ;;  %v1434_v11 = vadd.f32 %v2721_v9, %v1192_v7 }
 0x3a6   : > { %v1386_v12 = vpop.f32.mrf.mxu0 }
 0x3a7   : > { %1450 = vst [vmem:[#allocation4 + $0x60] sm:$0xff] %v1434_v11  ;;  %v1433_v13 = vadd.f32 %v1386_v12, %v1191_v10 }
 0x3a9   : > { %1449 = vst [vmem:[#allocation4 + $0x8] sm:$0xff] %v1433_v13 }
 0x3aa PF: > { %s4026_s27 = sld [smem:[#allocation30_spill]] }
 0x3b0   : > { %p2526_p1 = scmp.ne.s32.totalorder %s4026_s27, 1 }
 0x3b1   : > { %s4027_s24 = sld [smem:[#allocation29_spill]] (!%p2526_p1) }
 0x3b2   : > { %1482 = sbr.rel (%p2526_p1) target bundleno = 1524 (0x5f4), region = 80 }
 0x3b7   : > { %p2527_p12 = scmp.ne.s32.totalorder %s4027_s24, 0 }
 0x3b9   : > { %1485 = sbr.rel (%p2527_p12) target bundleno = 993 (0x3e1), region = 84 }
 0x3be   : > { %v1502_v14 = vld [vmem:[#allocation4 + $0x30] sm:$0xff]  ;;  %v1503_v16 = vld [vmem:[#allocation4 + $0x38] sm:$0xff]  ;;  %v1504_v17 = vld [vmem:[#allocation4 + $0x40] sm:$0xff] }
 0x3bf   : > { %v1518_v15 = vadd.f32 1e-06, %v1502_v14  ;;  %v1519_v18 = vadd.f32 1e-06, %v1503_v16  ;;  %v1520_v19 = vadd.f32 1e-06, %v1504_v17 }
 0x3c0   : > { %v1505_v20 = vld [vmem:[#allocation4 + $0x10] sm:$0xff]  ;;  %v1506_v22 = vld [vmem:[#allocation4 + $0x28] sm:$0xff]  ;;  %v1507_v24 = vld [vmem:[#allocation4] sm:$0xff] }
 0x3c1   : > { %2960 = vrcp.f32 %v1518_v15  ;;  %v1521_v21 = vadd.f32 1e-06, %v1505_v20  ;;  %v1522_v23 = vadd.f32 1e-06, %v1506_v22  ;;  %v1508_v28 = vld [vmem:[#allocation4 + $0x50] sm:$0xff]  ;;  %v1509_v31 = vld [vmem:[#allocation4 + $0x68] sm:$0xff] }
 0x3c2   : > { %2962 = vrcp.f32 %v1519_v18  ;;  %v1523_v29 = vadd.f32 1e-06, %v1507_v24  ;;  %v1524_v30 = vadd.f32 1e-06, %v1508_v28  ;;  %v1525_v32 = vadd.f32 1e-06, %v1509_v31 }
 0x3c3   : > { %2964 = vrcp.f32 %v1520_v19  ;;  %v1510_v33 = vld [vmem:[#allocation4 + $0x8] sm:$0xff]  ;;  %v1511_v41 = vld [vmem:[#allocation4 + $0x60] sm:$0xff]  ;;  %v1512_v42 = vld [vmem:[#allocation4 + $0x78] sm:$0xff] }
 0x3c4   : > { %2966 = vrcp.f32 %v1521_v21  ;;  %v1526_v40 = vadd.f32 1e-06, %v1510_v33  ;;  %v1527_v34 = vadd.f32 1e-06, %v1511_v41  ;;  %v1513_v43 = vld [vmem:[#allocation4 + $0x20] sm:$0xff]  ;;  %v1514_v44 = vld [vmem:[#allocation4 + $0x48] sm:$0xff] }
 0x3c5   : > { %2968 = vrcp.f32 %v1522_v23  ;;  %v1528_v35 = vadd.f32 1e-06, %v1512_v42  ;;  %v1529_v38 = vadd.f32 1e-06, %v1513_v43  ;;  %v1515_v45 = vld [vmem:[#allocation4 + $0x58] sm:$0xff]  ;;  %v1516_v46 = vld [vmem:[#allocation4 + $0x70] sm:$0xff] }
 0x3c6   : > { %2970 = vrcp.f32 %v1523_v29  ;;  %v1530_v39 = vadd.f32 1e-06, %v1514_v44  ;;  %v1517_v47 = vld [vmem:[#allocation4 + $0x18] sm:$0xff]  ;;  %v1531_v48 = vadd.f32 1e-06, %v1515_v45  ;;  %v1486_v50 = vld [vmem:[#allocation2] sm:$0xff] }
 0x3c7   : > { %2972 = vrcp.f32 %v1524_v30  ;;  %v1532_v49 = vadd.f32 1e-06, %v1516_v46  ;;  %v1533_v51 = vadd.f32 1e-06, %v1517_v47  ;;  %v1487_v52 = vld [vmem:[#allocation2 + $0x18] sm:$0xff]  ;;  %v1488_v54 = vld [vmem:[#allocation2 + $0x68] sm:$0xff] }
 0x3c8   : > { %2974 = vrcp.f32 %v1525_v32  ;;  %v1489_v57 = vld [vmem:[#allocation2 + $0x48] sm:$0xff]  ;;  %v1491_v63 = vld [vmem:[#allocation2 + $0xb8] sm:$0xff]  ;;  %v1492_v2 = vld [vmem:[#allocation2 + $0xf0] sm:$0xff] }
 0x3c9   : > { %2976 = vrcp.f32 %v1526_v40  ;;  %v1490_v60 = vld [vmem:[#allocation2 + $0x88] sm:$0xff]  ;;  %v1493_v5 = vld [vmem:[#allocation2 + $0x78] sm:$0xff]  ;;  %v1496_v15 = vld [vmem:[#allocation2 + $0x90] sm:$0xff] }
 0x3ca   : > { %2978 = vrcp.f32 %v1527_v34  ;;  %v1494_v9 = vld [vmem:[#allocation2 + $0x58] sm:$0xff]  ;;  %v1495_v12 = vld [vmem:[#allocation2 + $0xc8] sm:$0xff]  ;;  %v1497_v18 = vld [vmem:[#allocation2 + $0xc0] sm:$0xff] }
 0x3cb   : > { %2980 = vrcp.f32 %v1528_v35  ;;  %v1498_v21 = vld [vmem:[#allocation2 + $0xd0] sm:$0xff]  ;;  %v1499_v24 = vld [vmem:[#allocation2 + $0x28] sm:$0xff]  ;;  %v1500_v30 = vld [vmem:[#allocation2 + $0xf8] sm:$0xff] }
 0x3cc   : > { %2982 = vrcp.f32 %v1529_v38  ;;  %v1501_v33 = vld [vmem:[#allocation2 + $0x98] sm:$0xff] }
 0x3cd   : > { %2984 = vrcp.f32 %v1530_v39 }
 0x3ce   : > { %v2961_v53 = vpop.eup %2960  ;;  %2986 = vrcp.f32 %v1531_v48 }
 0x3cf   : > { %v2963_v55 = vpop.eup %2962  ;;  %v1550_v56 = vmul.f32 %v2961_v53, %v1486_v50  ;;  %2988 = vrcp.f32 %v1532_v49 }
 0x3d0   : > { %v2965_v58 = vpop.eup %2964  ;;  %v1551_v59 = vmul.f32 %v2963_v55, %v1487_v52  ;;  %2990 = vrcp.f32 %v1533_v51 }
 0x3d1   : > { %v2967_v61 = vpop.eup %2966  ;;  %1566 = vst [vmem:[#allocation8 + $0x18] sm:$0xff] %v1550_v56  ;;  %v1552_v62 = vmul.f32 %v2965_v58, %v1488_v54 }
 0x3d2   : > { %v2969_v0 = vpop.eup %2968  ;;  %1567 = vst [vmem:[#allocation8 + $0x48] sm:$0xff] %v1551_v59  ;;  %v1553_v1 = vmul.f32 %v2967_v61, %v1489_v57 }
 0x3d3   : > { %v2971_v3 = vpop.eup %2970  ;;  %1568 = vst [vmem:[#allocation8 + $0x40] sm:$0xff] %v1552_v62  ;;  %v1554_v4 = vmul.f32 %v2969_v0, %v1490_v60 }
 0x3d4   : > { %v2973_v7 = vpop.eup %2972  ;;  %1569 = vst [vmem:[#allocation8 + $0x60] sm:$0xff] %v1553_v1  ;;  %v1555_v8 = vmul.f32 %v2971_v3, %v1491_v63 }
 0x3d5   : > { %v2975_v10 = vpop.eup %2974  ;;  %1570 = vst [vmem:[#allocation8 + $0x38] sm:$0xff] %v1554_v4  ;;  %v1556_v11 = vmul.f32 %v2973_v7, %v1492_v2 }
 0x3d6   : > { %v2977_v13 = vpop.eup %2976  ;;  %1571 = vst [vmem:[#allocation8 + $0x30] sm:$0xff] %v1555_v8  ;;  %v1557_v14 = vmul.f32 %v2975_v10, %v1493_v5 }
 0x3d7   : > { %v2979_v16 = vpop.eup %2978  ;;  %1572 = vst [vmem:[#allocation8 + $0x10] sm:$0xff] %v1556_v11  ;;  %v1558_v17 = vmul.f32 %v2977_v13, %v1494_v9 }
 0x3d8   : > { %v2981_v19 = vpop.eup %2980  ;;  %1573 = vst [vmem:[#allocation8 + $0x58] sm:$0xff] %v1557_v14  ;;  %v1559_v20 = vmul.f32 %v2979_v16, %v1495_v12 }
 0x3d9   : > { %v2983_v22 = vpop.eup %2982  ;;  %1574 = vst [vmem:[#allocation8 + $0x28] sm:$0xff] %v1558_v17  ;;  %v1560_v23 = vmul.f32 %v2981_v19, %v1496_v15 }
 0x3da   : > { %v2985_v28 = vpop.eup %2984  ;;  %1575 = vst [vmem:[#allocation8] sm:$0xff] %v1559_v20  ;;  %v1561_v29 = vmul.f32 %v2983_v22, %v1497_v18 }
 0x3db   : > { %v2987_v31 = vpop.eup %2986  ;;  %1576 = vst [vmem:[#allocation8 + $0x68] sm:$0xff] %v1560_v23  ;;  %v1562_v32 = vmul.f32 %v2985_v28, %v1498_v21 }
 0x3dc   : > { %v2989_v40 = vpop.eup %2988  ;;  %1577 = vst [vmem:[#allocation8 + $0x70] sm:$0xff] %v1561_v29  ;;  %v1563_v41 = vmul.f32 %v2987_v31, %v1499_v24 }
 0x3dd   : > { %v2991_v42 = vpop.eup %2990  ;;  %1578 = vst [vmem:[#allocation8 + $0x20] sm:$0xff] %v1562_v32  ;;  %v1564_v34 = vmul.f32 %v2989_v40, %v1500_v30 }
 0x3de   : > { %1579 = vst [vmem:[#allocation8 + $0x78] sm:$0xff] %v1563_v41  ;;  %v1565_v43 = vmul.f32 %v2991_v42, %v1501_v33 }
 0x3df   : > { %1580 = vst [vmem:[#allocation8 + $0x8] sm:$0xff] %v1564_v34 }
 0x3e0   : > { %1581 = vst [vmem:[#allocation8 + $0x50] sm:$0xff] %v1565_v43 }
 0x3e1 PF: > { %2763 = vmatprep.mubr.f32.mxu0 %v953_v26  ;;  %1706 = vxpose.xlu0.b32.start [1/2] (short) %v3743_v37, 128  ;;  %v1606_v36 = vld [vmem:[#allocation8] sm:$0xff]  ;;  %v1605_v26 = vld [vmem:[#allocation8 + $0x28] sm:$0xff]  ;;  %v1604_v37 = vld [vmem:[#allocation8 + $0x58] sm:$0xff]  ;;  %s4028_s7 = sld [smem:[#allocation29_spill]]  ;;  %v1972_v60 = vlaneseq  ;;  %s1582_s22 = scalar_lea.vmem [#allocation9], %s2505_s10  ;;  %vm1738_vm1 = vcmask 130048  }
 0x3e2   : > { %v1607_v39 = vld [vmem:[#allocation8 + $0x68] sm:$0xff]  ;;  %v1603_v47 = vld [vmem:[#allocation8 + $0x10] sm:$0xff]  ;;  %v1601_v48 = vld [vmem:[#allocation8 + $0x38] sm:$0xff] }
 0x3e3   : > { %v1608_v46 = vld [vmem:[#allocation8 + $0x70] sm:$0xff]  ;;  %v1600_v49 = vld [vmem:[#allocation8 + $0x60] sm:$0xff]  ;;  %v1598_v51 = vld [vmem:[#allocation8 + $0x48] sm:$0xff]  ;;  %v1973_v62 = vshrl.u32 %v1972_v60, 7 }
 0x3e4   : > { %v1609_v45 = vld [vmem:[#allocation8 + $0x20] sm:$0xff]  ;;  %v1597_v52 = vld [vmem:[#allocation8 + $0x18] sm:$0xff] }
 0x3e5   : > { %v1610_v38 = vld [vmem:[#allocation8 + $0x78] sm:$0xff]  ;;  %1707 = vxpose.xlu0.b32.end [2/2] (short) %v3747_v6, 128  ;;  %v1602_v6 = vld [vmem:[#allocation8 + $0x30] sm:$0xff]  ;;  %v1599_v50 = vld [vmem:[#allocation8 + $0x40] sm:$0xff]  ;;  %v1974_v63 = vsub.s32 0, %v1973_v62 }
 0x3e6   : > { %v1611_v44 = vld [vmem:[#allocation8 + $0x8] sm:$0xff]  ;;  %v1964_v53 = vld [vmem:[#allocation6] sm:$0x1]  ;;  %v1966_v54 = vld [vmem:[#allocation7] sm:$0x1] }
 0x3e7   : > { %v1612_v35 = vld [vmem:[#allocation8 + $0x50] sm:$0xff]  ;;  %v1965_v55 = vmul.f32 0.03125, %v1964_v53  ;;  %v1967_v56 = vmul.f32 0.03125, %v1966_v54  ;;  %v1584_v1 = vld [vmem:[%s1582_s22 + $0x8] sm:$0xff]  ;;  %v1583_v25 = vld [vmem:[%s1582_s22] sm:$0xff]  ;;  %p2546_p5 = scmp.ne.s32.totalorder %s4028_s7, 1 }
 0x3e8   : > { %2731 = vmatprep.subr.mxu0 %v1612_v35  ;;  %v1990_v9 = vld [vmem:[%s3573_s6 + $0x8] sm:$0xff]  ;;  %v1989_v10 = vld [vmem:[%s3573_s6] sm:$0xff]  ;;  %v2529_v18 = vmul.f32 -1.442695, %v1584_v1  ;;  %v2528_v19 = vmul.f32 -1.442695, %v1583_v25 }
 0x3e9   : > { %2732 = vmatpush3.msra.mxu0 %v1612_v35  ;;  %v1968_v57 = vmul.f32 %v1965_v55, %v1965_v55  ;;  %v1975_v0 = vrot.slane %v1965_v55, %v1974_v63  ;;  %v1695_v54 = vld [vmem:[#allocation5 + $0x18] sm:$0xff]  ;;  %v1697_v60 = vld [vmem:[#allocation5 + $0x60] sm:$0xff] }
 0x3ea   : > { %2733 = vmatprep.subr.mxu0 %v1611_v44 }
 0x3eb   : > { %2734 = vmatpush3.msra.mxu0 %v1611_v44  ;;  %v1969_v58 = vsub.f32 %v1967_v56, %v1968_v57  ;;  %v1977_v2 = vsub.f32 %v1583_v25, %v1975_v0  ;;  %v1694_v57 = vld [vmem:[#allocation5 + $0x70] sm:$0xff]  ;;  %v1699_v25 = vld [vmem:[#allocation5 + $0x20] sm:$0xff] }
 0x3ec   : > { %2735 = vmatprep.subr.mxu0 %v1610_v38 }
 0x3ed   : > { %2736 = vmatpush3.msra.mxu0 %v1610_v38  ;;  %v1970_v59 = vmax.f32 %v1969_v58, 0.0 }
 0x3ee   : > { %2737 = vmatprep.subr.mxu0 %v1609_v45 }
 0x3ef   : > { %2738 = vmatpush3.msra.mxu0 %v1609_v45  ;;  %v1979_v61 = vadd.f32 1e-05, %v1970_v59 }
 0x3f0   : > { %2739 = vmatprep.subr.mxu0 %v1608_v46 }
 0x3f1   : > { %2740 = vmatpush3.msra.mxu0 %v1608_v46  ;;  %2992 = vrsqrt.f32 %v1979_v61 }
 0x3f2   : > { %2741 = vmatprep.subr.mxu0 %v1607_v39  ;;  %2994 = vpow2.f32 %v2529_v18 }
 0x3f3   : > { %2742 = vmatpush3.msra.mxu0 %v1607_v39  ;;  %2996 = vpow2.f32 %v2528_v19  ;;  %v1705_v19 = vld [vmem:[#allocation5 + $0x38] sm:$0xff] }
 0x3f4   : > { %2743 = vmatprep.subr.mxu0 %v1606_v36 }
 0x3f5   : > { %2744 = vmatpush3.msra.mxu0 %v1606_v36  ;;  %v1691_v36 = vld [vmem:[#allocation5 + $0x10] sm:$0xff] }
 0x3f6   : > { %2745 = vmatprep.subr.mxu0 %v1605_v26 }
 0x3f7   : > { %2746 = vmatpush3.msra.mxu0 %v1605_v26 }
 0x3f8   : > { %2747 = vmatprep.subr.mxu0 %v1604_v37 }
 0x3f9   : > { %2748 = vmatpush3.msra.mxu0 %v1604_v37  ;;  %v1690_v37 = vld [vmem:[#allocation5 + $0x68] sm:$0xff] }
 0x3fa   : > { %2749 = vmatprep.subr.mxu0 %v1603_v47 }
 0x3fb   : > { %2750 = vmatpush3.msra.mxu0 %v1603_v47 }
 0x3fc   : > { %2751 = vmatprep.subr.mxu0 %v1602_v6 }
 0x3fd   : > { %2752 = vmatpush3.msra.mxu0 %v1602_v6 }
 0x3fe   : > { %2753 = vmatprep.subr.mxu0 %v1601_v48  ;;  %v2993_v3 = vpop.eup %2992 }
 0x3ff   : > { %2754 = vmatpush3.msra.mxu0 %v1601_v48  ;;  %v1985_v4 = vrot.slane %v2993_v3, %v1974_v63  ;;  %v2995_v22 = vpop.eup %2994  ;;  %v1693_v48 = vld [vmem:[#allocation5 + $0x50] sm:$0xff]  ;;  %v1696_v63 = vld [vmem:[#allocation5 + $0x58] sm:$0xff]  ;;  %v1698_v3 = vld [vmem:[#allocation5 + $0x28] sm:$0xff] }
 0x400   : > { %2755 = vmatprep.subr.mxu0 %v1600_v49  ;;  %v2997_v24 = vpop.eup %2996  ;;  %v1592_v28 = vadd.f32 1.0, %v2995_v22  ;;  %v1704_v22 = vld [vmem:[#allocation5 + $0x78] sm:$0xff] }
 0x401   : > { %2756 = vmatpush3.msra.mxu0 %v1600_v49  ;;  %v1987_v8 = vmul.f32 %v1985_v4, %v1977_v2  ;;  %v1591_v29 = vadd.f32 1.0, %v2997_v24 }
 0x402   : > { %2757 = vmatprep.subr.mxu0 %v1599_v50  ;;  %2998 = vrcp.f32 %v1592_v28 }
 0x403   : > { %2758 = vmatpush3.msra.mxu0 %v1599_v50  ;;  %v1991_v12 = vmax.f32 %v1987_v8, 0.0  ;;  %3000 = vrcp.f32 %v1591_v29 }
 0x404   : > { %2759 = vmatprep.subr.mxu0 %v1598_v51 }
 0x405   : > { %2760 = vmatpush3.msra.mxu0 %v1598_v51  ;;  %v1993_v14 = vadd.f32 %v1991_v12, %v1989_v10  ;;  %v1692_v51 = vld [vmem:[#allocation5 + $0x30] sm:$0xff]  ;;  %v1700_v10 = vld [vmem:[#allocation5 + $0x8] sm:$0xff] }
 0x406   : > { %2761 = vmatprep.subr.mxu0 %v1597_v52 }
 0x407   : > { %2762 = vmatpush3.msra.mxu0 %v1597_v52  ;;  %1995 = vst [vmem:[%s3589_s19] sm:$0xff] %v1993_v14 }
 0x408   : > { %2764 = vmatmul.mubr.f32.vlgmr.msra.gmra.mxu0 %v955_v27  ;;  %v1978_v27 = vsub.f32 %v1584_v1, %v1975_v0 }
 0x40a   : > { %v1988_v7 = vmul.f32 %v1985_v4, %v1978_v27 }
 0x40c   : > { %v1992_v11 = vmax.f32 %v1988_v7, 0.0  ;;  %v1701_v7 = vld [vmem:[#allocation5 + $0x40] sm:$0xff] }
 0x40e   : > { %v1994_v13 = vadd.f32 %v1992_v11, %v1990_v9 }
 0x40f   : > { %v2999_v33 = vpop.eup %2998 }
 0x410   : > { %1996 = vst [vmem:[%s3589_s19 + $0x8] sm:$0xff] %v1994_v13  ;;  %v3001_v40 = vpop.eup %3000  ;;  %v1703_v13 = vld [vmem:[#allocation5] sm:$0xff] }
 0x45d   : > { %v1722_v5 = vpop.trf.xlu0 }
 0x45e   : > { %2770 = vmatprep.mubr.msk.f32.mxu1 %vm1738_vm1, %v1722_v5 }
 0x461   : > { %v1723_v15 = vpop.trf.xlu0 }
 0x465   : > { %v1724_v16 = vpop.trf.xlu0 }
 0x469   : > { %v1725_v17 = vpop.trf.xlu0 }
 0x46d   : > { %v1726_v20 = vpop.trf.xlu0 }
 0x471   : > { %v1727_v21 = vpop.trf.xlu0 }
 0x475   : > { %v1728_v23 = vpop.trf.xlu0 }
 0x479   : > { %v1729_v30 = vpop.trf.xlu0 }
 0x47d   : > { %v1730_v31 = vpop.trf.xlu0 }
 0x481   : > { %v1731_v32 = vpop.trf.xlu0 }
 0x485   : > { %v1732_v43 = vpop.trf.xlu0 }
 0x489   : > { %v1733_v44 = vpop.trf.xlu0 }
 0x48d   : > { %v1734_v38 = vpop.trf.xlu0 }
 0x491   : > { %v1735_v45 = vpop.trf.xlu0 }
 0x495   : > { %v1736_v46 = vpop.trf.xlu0 }
 0x499   : > { %v1737_v39 = vpop.trf.xlu0 }
 0x4c8   : > { %v2765_v41 = vpop.f32.mrf.mxu0 }
 0x4c9   : > { %v1689_v42 = vmul.f32 %v2999_v33, %v2765_v41 }
 0x4ca   : > { %v1679_v34 = vpop.f32.mrf.mxu0 }
 0x4cb   : > { %v1688_v35 = vmul.f32 %v3001_v40, %v1679_v34  ;;  %2766 = vmatprep.subr.mxu1 %v1689_v42 }
 0x4cc   : > { %2767 = vmatpush3.msra.mxu1 %v1689_v42 }
 0x4cd   : > { %2768 = vmatprep.subr.mxu1 %v1688_v35 }
 0x4ce   : > { %2769 = vmatpush3.msra.mxu1 %v1688_v35 }
 0x4cf   : > { %2771 = vmatmul.mubr.msk.f32.vlgmr.msra.gmra.mxu1 %vm1738_vm1, %v1723_v15 }
 0x4d0   : > { %2773 = vmatprep.mubr.msk.f32.mxu1 %vm1738_vm1, %v1724_v16  ;;  %v1702_v16 = vld [vmem:[#allocation5 + $0x48] sm:$0xff] }
 0x4d3   : > { %2774 = vmatmul.mubr.msk.f32.gmra.mxu1 %vm1738_vm1, %v1725_v17 }
 0x4d4   : > { %2776 = vmatprep.mubr.msk.f32.mxu1 %vm1738_vm1, %v1726_v20 }
 0x4d7   : > { %2777 = vmatmul.mubr.msk.f32.gmra.mxu1 %vm1738_vm1, %v1727_v21 }
 0x4d8   : > { %2779 = vmatprep.mubr.msk.f32.mxu1 %vm1738_vm1, %v1728_v23 }
 0x4db   : > { %2780 = vmatmul.mubr.msk.f32.gmra.mxu1 %vm1738_vm1, %v1729_v30 }
 0x4dc   : > { %2782 = vmatprep.mubr.msk.f32.mxu1 %vm1738_vm1, %v1730_v31 }
 0x4df   : > { %2783 = vmatmul.mubr.msk.f32.gmra.mxu1 %vm1738_vm1, %v1731_v32 }
 0x4e0   : > { %2785 = vmatprep.mubr.msk.f32.mxu1 %vm1738_vm1, %v1732_v43 }
 0x4e3   : > { %2786 = vmatmul.mubr.msk.f32.gmra.mxu1 %vm1738_vm1, %v1733_v44 }
 0x4e4   : > { %2788 = vmatprep.mubr.msk.f32.mxu1 %vm1738_vm1, %v1734_v38 }
 0x4e7   : > { %2789 = vmatmul.mubr.msk.f32.gmra.mxu1 %vm1738_vm1, %v1735_v45 }
 0x4e8   : > { %2791 = vmatprep.mubr.msk.f32.mxu1 %vm1738_vm1, %v1736_v46 }
 0x4eb   : > { %2792 = vmatmul.mubr.msk.f32.gmra.mxu1 %vm1738_vm1, %v1737_v39 }
 0x58f   : > { %v2772_v26 = vpop.f32.mrf.mxu1 }
 0x590   : > { %v1933_v47 = vadd.f32 %v2772_v26, %v1691_v36 }
 0x591   : > { %v1853_v6 = vpop.f32.mrf.mxu1 }
 0x592   : > { %1949 = vst [vmem:[#allocation5 + $0x10] sm:$0xff] %v1933_v47  ;;  %v1932_v49 = vadd.f32 %v1853_v6, %v1690_v37 }
 0x593   : > { %v2775_v50 = vpop.f32.mrf.mxu1 }
 0x594   : > { %1948 = vst [vmem:[#allocation5 + $0x68] sm:$0xff] %v1932_v49  ;;  %v1935_v52 = vadd.f32 %v2775_v50, %v1693_v48 }
 0x595   : > { %v1863_v53 = vpop.f32.mrf.mxu1 }
 0x596   : > { %1951 = vst [vmem:[#allocation5 + $0x50] sm:$0xff] %v1935_v52  ;;  %v1934_v55 = vadd.f32 %v1863_v53, %v1692_v51 }
 0x597   : > { %v2778_v56 = vpop.f32.mrf.mxu1 }
 0x598   : > { %1950 = vst [vmem:[#allocation5 + $0x30] sm:$0xff] %v1934_v55  ;;  %v1937_v58 = vadd.f32 %v2778_v56, %v1695_v54 }
 0x599   : > { %v1873_v59 = vpop.f32.mrf.mxu1 }
 0x59a   : > { %1953 = vst [vmem:[#allocation5 + $0x18] sm:$0xff] %v1937_v58  ;;  %v1936_v61 = vadd.f32 %v1873_v59, %v1694_v57 }
 0x59b   : > { %v2781_v62 = vpop.f32.mrf.mxu1 }
 0x59c   : > { %1952 = vst [vmem:[#allocation5 + $0x70] sm:$0xff] %v1936_v61  ;;  %v1939_v0 = vadd.f32 %v2781_v62, %v1697_v60 }
 0x59d   : > { %v1883_v1 = vpop.f32.mrf.mxu1 }
 0x59e   : > { %1955 = vst [vmem:[#allocation5 + $0x60] sm:$0xff] %v1939_v0  ;;  %v1938_v27 = vadd.f32 %v1883_v1, %v1696_v63 }
 0x59f   : > { %v2784_v2 = vpop.f32.mrf.mxu1 }
 0x5a0   : > { %1954 = vst [vmem:[#allocation5 + $0x58] sm:$0xff] %v1938_v27  ;;  %v1941_v4 = vadd.f32 %v2784_v2, %v1699_v25 }
 0x5a1   : > { %v1893_v5 = vpop.f32.mrf.mxu1 }
 0x5a2   : > { %1957 = vst [vmem:[#allocation5 + $0x20] sm:$0xff] %v1941_v4  ;;  %v1940_v8 = vadd.f32 %v1893_v5, %v1698_v3 }
 0x5a3   : > { %v2787_v9 = vpop.f32.mrf.mxu1 }
 0x5a4   : > { %1956 = vst [vmem:[#allocation5 + $0x28] sm:$0xff] %v1940_v8  ;;  %v1943_v11 = vadd.f32 %v2787_v9, %v1701_v7 }
 0x5a5   : > { %v1903_v12 = vpop.f32.mrf.mxu1 }
 0x5a6   : > { %1959 = vst [vmem:[#allocation5 + $0x40] sm:$0xff] %v1943_v11  ;;  %v1942_v14 = vadd.f32 %v1903_v12, %v1700_v10 }
 0x5a7   : > { %v2790_v15 = vpop.f32.mrf.mxu1 }
 0x5a8   : > { %1958 = vst [vmem:[#allocation5 + $0x8] sm:$0xff] %v1942_v14  ;;  %v1945_v17 = vadd.f32 %v2790_v15, %v1703_v13 }
 0x5a9   : > { %v1913_v18 = vpop.f32.mrf.mxu1 }
 0x5aa   : > { %1961 = vst [vmem:[#allocation5] sm:$0xff] %v1945_v17  ;;  %v1944_v20 = vadd.f32 %v1913_v18, %v1702_v16 }
 0x5ab   : > { %v2793_v21 = vpop.f32.mrf.mxu1 }
 0x5ac   : > { %1960 = vst [vmem:[#allocation5 + $0x48] sm:$0xff] %v1944_v20  ;;  %v1947_v23 = vadd.f32 %v2793_v21, %v1705_v19  ;;  %2000 = sbr.rel (%p2546_p5) target bundleno = 1524 (0x5f4), region = 88 }
 0x5ad   : > { %v1923_v24 = vpop.f32.mrf.mxu1 }
 0x5ae   : > { %1963 = vst [vmem:[#allocation5 + $0x38] sm:$0xff] %v1947_v23  ;;  %v1946_v28 = vadd.f32 %v1923_v24, %v1704_v22 }
 0x5b0   : > { %1962 = vst [vmem:[#allocation5 + $0x78] sm:$0xff] %v1946_v28 }
 0x5b1   : > { %v2001_v29 = vld [vmem:[#allocation2 + $0xb0] sm:$0xff]  ;;  %v2017_v30 = vld [vmem:[#allocation5 + $0x68] sm:$0xff]  ;;  %v2002_v6 = vld [vmem:[#allocation2 + $0xd8] sm:$0xff] }
 0x5b2   : > { %v2033_v31 = vadd.f32 %v2017_v30, %v2001_v29  ;;  %v2018_v48 = vld [vmem:[#allocation5 + $0x10] sm:$0xff]  ;;  %v2005_v53 = vld [vmem:[#allocation2 + $0x80] sm:$0xff]  ;;  %v2006_v55 = vld [vmem:[#allocation2 + $0xe8] sm:$0xff] }
 0x5b3   : > { %v2003_v49 = vld [vmem:[#allocation2 + $0x50] sm:$0xff]  ;;  %v2022_v56 = vld [vmem:[#allocation5 + $0x18] sm:$0xff]  ;;  %v2007_v57 = vld [vmem:[#allocation2 + $0x60] sm:$0xff]  ;;  %v2034_v9 = vadd.f32 %v2018_v48, %v2002_v6 }
 0x5b4   : > { %v2145_v32 = vrot.slane %v2033_v31, 4  ;;  %v2019_v50 = vld [vmem:[#allocation5 + $0x30] sm:$0xff]  ;;  %v2023_v58 = vld [vmem:[#allocation5 + $0x58] sm:$0xff]  ;;  %v2008_v59 = vld [vmem:[#allocation2 + $0x8] sm:$0xff]  ;;  %v2038_v16 = vadd.f32 %v2022_v56, %v2006_v55 }
 0x5b5   : > { %v2004_v51 = vld [vmem:[#allocation2 + $0x30] sm:$0xff]  ;;  %v2024_v60 = vld [vmem:[#allocation5 + $0x60] sm:$0xff]  ;;  %v2009_v61 = vld [vmem:[#allocation2 + $0x38] sm:$0xff]  ;;  %v2035_v10 = vadd.f32 %v2019_v50, %v2003_v49  ;;  %v2039_v17 = vadd.f32 %v2023_v58, %v2007_v57 }
 0x5b6   : > { %v2146_v33 = vadd.f32 %v2145_v32, %v2033_v31  ;;  %v2020_v52 = vld [vmem:[#allocation5 + $0x50] sm:$0xff]  ;;  %v2025_v62 = vld [vmem:[#allocation5 + $0x28] sm:$0xff]  ;;  %v2010_v63 = vld [vmem:[#allocation2 + $0x40] sm:$0xff]  ;;  %v2040_v18 = vadd.f32 %v2024_v60, %v2008_v59 }
 0x5b7   : > { %v2021_v54 = vld [vmem:[#allocation5 + $0x70] sm:$0xff]  ;;  %v2026_v0 = vld [vmem:[#allocation5 + $0x20] sm:$0xff]  ;;  %v2027_v25 = vld [vmem:[#allocation5 + $0x8] sm:$0xff]  ;;  %v2036_v11 = vadd.f32 %v2020_v52, %v2004_v51  ;;  %v2041_v19 = vadd.f32 %v2025_v62, %v2009_v61 }
 0x5b8   : > { %v2147_v40 = vrot.slane %v2146_v33, 2  ;;  %v2011_v1 = vld [vmem:[#allocation2 + $0xe0] sm:$0xff]  ;;  %v2012_v27 = vld [vmem:[#allocation2 + $0x70] sm:$0xff]  ;;  %v2013_v3 = vld [vmem:[#allocation2 + $0xa8] sm:$0xff]  ;;  %v2037_v15 = vadd.f32 %v2021_v54, %v2005_v53  ;;  %v2042_v20 = vadd.f32 %v2026_v0, %v2010_v63 }
 0x5b9   : > { %v2028_v2 = vld [vmem:[#allocation5 + $0x40] sm:$0xff]  ;;  %v2029_v4 = vld [vmem:[#allocation5 + $0x48] sm:$0xff]  ;;  %v2014_v5 = vld [vmem:[#allocation2 + $0x10] sm:$0xff]  ;;  %v3846_v21 = vadd.f32 %v2027_v25, %v2011_v1 }
 0x5ba   : > { %v2148_v41 = vadd.f32 %v2147_v40, %v2146_v33  ;;  %v2030_v7 = vld [vmem:[#allocation5] sm:$0xff]  ;;  %v2031_v12 = vld [vmem:[#allocation5 + $0x78] sm:$0xff]  ;;  %v3848_v22 = vadd.f32 %v2028_v2, %v2012_v27  ;;  %v3850_v23 = vadd.f32 %v2029_v4, %v2013_v3  ;;  %v2241_v49 = vld [vmem:[#allocation10 + $0x8] sm:$0xff] }
 0x5bb   : > { %v2015_v8 = vld [vmem:[#allocation2 + $0xa0] sm:$0xff]  ;;  %v2032_v14 = vld [vmem:[#allocation5 + $0x38] sm:$0xff]  ;;  %v3852_v24 = vadd.f32 %v2030_v7, %v2014_v5  ;;  %v2245_v57 = vld [vmem:[#allocation10 + $0x28] sm:$0xff] }
 0x5bc   : > { %v2149_v42 = vrot.slane %v2148_v41, 1  ;;  %v2016_v13 = vld [vmem:[#allocation2 + $0x20] sm:$0xff]  ;;  %v3854_v28 = vadd.f32 %v2031_v12, %v2015_v8  ;;  %v2242_v51 = vld [vmem:[#allocation10 + $0x10] sm:$0xff] }
 0x5bd   : > { %v3856_v29 = vadd.f32 %v2032_v14, %v2016_v13  ;;  %v2240_v6 = vld [vmem:[#allocation10] sm:$0xff]  ;;  %v2243_v53 = vld [vmem:[#allocation10 + $0x18] sm:$0xff]  ;;  %v2249_v14 = vld [vmem:[#allocation10 + $0x48] sm:$0xff] }
 0x5be   : > { %v2150_v34 = vadd.f32 %v2149_v42, %v2148_v41  ;;  %v2244_v55 = vld [vmem:[#allocation10 + $0x20] sm:$0xff]  ;;  %v2247_v0 = vld [vmem:[#allocation10 + $0x38] sm:$0xff] }
 0x5bf   : > { %v2248_v12 = vld [vmem:[#allocation10 + $0x40] sm:$0xff] }
 0x5c0   : > { %v3839_v43 = vmul.f32 0.125, %v2150_v34 }
 0x5c2   : > { %v3842_v35 = vsub.f32 %v2033_v31, %v3839_v43  ;;  %v2153_v30 = vsub.f32 %v2034_v9, %v3839_v43  ;;  %v2154_v31 = vsub.f32 %v2035_v10, %v3839_v43  ;;  %v2155_v32 = vsub.f32 %v2036_v11, %v3839_v43 }
 0x5c3   : > { %v2156_v33 = vsub.f32 %v2037_v15, %v3839_v43  ;;  %v2157_v40 = vsub.f32 %v2038_v16, %v3839_v43  ;;  %v2158_v41 = vsub.f32 %v2039_v17, %v3839_v43  ;;  %v2159_v42 = vsub.f32 %v2040_v18, %v3839_v43  ;;  %v2250_v16 = vld [vmem:[#allocation10 + $0x50] sm:$0xff]  ;;  %v2251_v18 = vld [vmem:[#allocation10 + $0x58] sm:$0xff] }
 0x5c4   : > { %v2184_v44 = vmul.f32 %v3842_v35, %v3842_v35  ;;  %v2160_v34 = vsub.f32 %v2041_v19, %v3839_v43 }
 0x5c6   : > { %v2215_v38 = vrot.slane %v2184_v44, 4 }
 0x5c8   : > { %v2216_v45 = vadd.f32 %v2215_v38, %v2184_v44  ;;  %v2161_v44 = vsub.f32 %v2042_v20, %v3839_v43  ;;  %v2162_v38 = vsub.f32 %v3846_v21, %v3839_v43  ;;  %v2252_v20 = vld [vmem:[#allocation10 + $0x60] sm:$0xff] }
 0x5ca   : > { %v2217_v46 = vrot.slane %v2216_v45, 2 }
 0x5cc   : > { %v2218_v39 = vadd.f32 %v2217_v46, %v2216_v45  ;;  %v2163_v45 = vsub.f32 %v3848_v22, %v3839_v43  ;;  %v2253_v22 = vld [vmem:[#allocation10 + $0x68] sm:$0xff] }
 0x5ce   : > { %v2219_v36 = vrot.slane %v2218_v39, 1 }
 0x5d0   : > { %v2220_v26 = vadd.f32 %v2219_v36, %v2218_v39  ;;  %v2164_v39 = vsub.f32 %v3850_v23, %v3839_v43  ;;  %v2165_v36 = vsub.f32 %v3852_v24, %v3839_v43 }
 0x5d2   : > { %v2221_v37 = vmul.f32 0.125, %v2220_v26  ;;  %v2166_v26 = vsub.f32 %v3854_v28, %v3839_v43 }
 0x5d4   : > { %v2222_v47 = vadd.f32 1e-05, %v2221_v37  ;;  %v2167_v37 = vsub.f32 %v3856_v29, %v3839_v43  ;;  %v2246_v43 = vld [vmem:[#allocation10 + $0x30] sm:$0xff] }
 0x5d6   : > { %3002 = vrsqrt.f32 %v2222_v47 }
 0x5e3   : > { %v3003_v46 = vpop.eup %3002 }
 0x5e4   : > { %v2224_v47 = vmul.f32 %v3003_v46, %v3842_v35  ;;  %v2225_v48 = vmul.f32 %v3003_v46, %v2153_v30  ;;  %v2226_v50 = vmul.f32 %v3003_v46, %v2154_v31  ;;  %v2227_v52 = vmul.f32 %v3003_v46, %v2155_v32  ;;  %v2254_v32 = vld [vmem:[#allocation10 + $0x70] sm:$0xff] }
 0x5e5   : > { %v2228_v54 = vmul.f32 %v3003_v46, %v2156_v33  ;;  %v2229_v56 = vmul.f32 %v3003_v46, %v2157_v40  ;;  %v2230_v58 = vmul.f32 %v3003_v46, %v2158_v41  ;;  %v2231_v59 = vmul.f32 %v3003_v46, %v2159_v42  ;;  %v2255_v33 = vld [vmem:[#allocation10 + $0x78] sm:$0xff] }
 0x5e6   : > { %v2256_v60 = vmax.f32 %v2224_v47, 0.0  ;;  %v2257_v61 = vmax.f32 %v2225_v48, 0.0  ;;  %v2258_v62 = vmax.f32 %v2226_v50, 0.0  ;;  %v2259_v63 = vmax.f32 %v2227_v52, 0.0 }
 0x5e7   : > { %v2260_v35 = vmax.f32 %v2228_v54, 0.0  ;;  %v2261_v1 = vmax.f32 %v2229_v56, 0.0  ;;  %v2262_v25 = vmax.f32 %v2230_v58, 0.0  ;;  %v2263_v27 = vmax.f32 %v2231_v59, 0.0 }
 0x5e8   : > { %v2272_v2 = vadd.f32 %v2256_v60, %v2240_v6  ;;  %v2273_v3 = vadd.f32 %v2257_v61, %v2241_v49  ;;  %v2274_v4 = vadd.f32 %v2258_v62, %v2242_v51  ;;  %v2275_v5 = vadd.f32 %v2259_v63, %v2243_v53 }
 0x5e9   : > { %v2276_v7 = vadd.f32 %v2260_v35, %v2244_v55  ;;  %v2277_v8 = vadd.f32 %v2261_v1, %v2245_v57  ;;  %v2278_v9 = vadd.f32 %v2262_v25, %v2246_v43  ;;  %v2279_v10 = vadd.f32 %v2263_v27, %v2247_v0 }
 0x5ea   : > { %2288 = vst [vmem:[#allocation19] sm:$0xff] %v2272_v2  ;;  %2289 = vst [vmem:[#allocation19 + $0x8] sm:$0xff] %v2273_v3  ;;  %v2232_v11 = vmul.f32 %v3003_v46, %v2160_v34  ;;  %v2233_v13 = vmul.f32 %v3003_v46, %v2161_v44  ;;  %v2234_v15 = vmul.f32 %v3003_v46, %v2162_v38 }
 0x5eb   : > { %2290 = vst [vmem:[#allocation19 + $0x10] sm:$0xff] %v2274_v4  ;;  %2291 = vst [vmem:[#allocation19 + $0x18] sm:$0xff] %v2275_v5  ;;  %v2235_v17 = vmul.f32 %v3003_v46, %v2163_v45  ;;  %v2236_v19 = vmul.f32 %v3003_v46, %v2164_v39  ;;  %v2237_v21 = vmul.f32 %v3003_v46, %v2165_v36 }
 0x5ec   : > { %2292 = vst [vmem:[#allocation19 + $0x20] sm:$0xff] %v2276_v7  ;;  %2293 = vst [vmem:[#allocation19 + $0x28] sm:$0xff] %v2277_v8  ;;  %v2238_v23 = vmul.f32 %v3003_v46, %v2166_v26  ;;  %v2239_v24 = vmul.f32 %v3003_v46, %v2167_v37  ;;  %v2264_v28 = vmax.f32 %v2232_v11, 0.0  ;;  %v2265_v29 = vmax.f32 %v2233_v13, 0.0 }
 0x5ed   : > { %2294 = vst [vmem:[#allocation19 + $0x30] sm:$0xff] %v2278_v9  ;;  %2295 = vst [vmem:[#allocation19 + $0x38] sm:$0xff] %v2279_v10  ;;  %v2266_v30 = vmax.f32 %v2234_v15, 0.0  ;;  %v2267_v31 = vmax.f32 %v2235_v17, 0.0  ;;  %v2268_v40 = vmax.f32 %v2236_v19, 0.0  ;;  %v2269_v41 = vmax.f32 %v2237_v21, 0.0 }
 0x5ee   : > { %v2270_v42 = vmax.f32 %v2238_v23, 0.0  ;;  %v2271_v34 = vmax.f32 %v2239_v24, 0.0  ;;  %v2280_v44 = vadd.f32 %v2264_v28, %v2248_v12  ;;  %v2281_v38 = vadd.f32 %v2265_v29, %v2249_v14 }
 0x5ef   : > { %v2282_v45 = vadd.f32 %v2266_v30, %v2250_v16  ;;  %v2283_v47 = vadd.f32 %v2267_v31, %v2251_v18  ;;  %v2284_v39 = vadd.f32 %v2268_v40, %v2252_v20  ;;  %v2285_v6 = vadd.f32 %v2269_v41, %v2253_v22 }
 0x5f0   : > { %v2286_v36 = vadd.f32 %v2270_v42, %v2254_v32  ;;  %v2287_v48 = vadd.f32 %v2271_v34, %v2255_v33  ;;  %2296 = vst [vmem:[#allocation19 + $0x40] sm:$0xff] %v2280_v44  ;;  %2297 = vst [vmem:[#allocation19 + $0x48] sm:$0xff] %v2281_v38 }
 0x5f1   : > { %2298 = vst [vmem:[#allocation19 + $0x50] sm:$0xff] %v2282_v45  ;;  %2299 = vst [vmem:[#allocation19 + $0x58] sm:$0xff] %v2283_v47 }
 0x5f2   : > { %2300 = vst [vmem:[#allocation19 + $0x60] sm:$0xff] %v2284_v39  ;;  %2301 = vst [vmem:[#allocation19 + $0x68] sm:$0xff] %v2285_v6 }
 0x5f3   : > { %2302 = vst [vmem:[#allocation19 + $0x70] sm:$0xff] %v2286_v36  ;;  %2303 = vst [vmem:[#allocation19 + $0x78] sm:$0xff] %v2287_v48 }
 0x5f4 PF: > { %s3306_s6 = smov [#allocation19]   ;;  %p4029_p6 = scmp.eq.s32.totalorder %s3409_s16, 3 }
 0x5f5   : > { %s2315_s23 = sshll.u32 %s3306_s6, 4  ;;  %s2316_s23 = int_to_ptr.vmem [resolvable:$true] %s2315_s23 }
 0x5f6   : > { %s3138_s18 = scalar_lea.vmem %s2316_s23, 2048  ;;  %p3145_p11 = scmp.lt.s32.totalorder %s2316_s23, %s2316_s23 }
 0x5f7   : > { %p3139_p2 = scmp.ne.s32.totalorder %s2316_s23, %s3138_s18  ;;  %p3146_p4 = scmp.lt.s32.totalorder %s3138_s18, %s3138_s18 }
 0x5f9   : > { %p3140_p13 = pnand %p3139_p2, %p4029_p6  ;;  %p3147_p0 = por %p3146_p4, %p3145_p11 }
 0x5fb   : > { %p3141_p8 = pneg %p3140_p13 }
 0x5fd   : > { %p3148_p9 = pnand %p3147_p0, %p3141_p8 }
 0x5ff   : > { %3151 = shalt.err (!%p3148_p9)
}
 0x600   : > { %s3307_s11 = smov 128   ;;  %s4030_s12 = sld [smem:[#allocation30_spill]] }
 0x601   : > { %s4031_s1 = sld [smem:[#allocation29_spill]]  ;;  %s3308_s14 = smov 8  }
 0x602   : > { %p4033_p10 = pmov %p4029_p6  ;;  %s4034_s21 = sld [smem:[#allocation41_spill]] }
 0x603   : > { %s2332_s17 = sshll.u32 %s3589_s19, 4  ;;  %s4035_s24 = sld [smem:[#allocation42_spill]]  ;;  %s3893_s17 = int_to_ptr.vmem [resolvable:$true] %s2332_s17 }
 0x604   : > { %s2305_s22 = scalar_lea.sflag [#allocation21], %s416_s3  ;;  %s3162_s6 = scalar_lea.vmem %s3893_s17, 256 }
 0x605   : > { %p3163_p3 = scmp.ne.s32.totalorder %s3893_s17, %s3162_s6 }
 0x607   : > { %s2325_s26 = smul.u32 %s4031_s1, %s4030_s12  ;;  %p3164_p1 = pnand %p3163_p3, %p3428_p7 }
 0x608   : > { %2815 = dma.vmem_to_hbm [thread:$0]  (%p4033_p10), %s2316_s23, 2048, %s4034_s21, [#allocation12], %s3307_s11, %s3307_s11, %s3308_s14  }
 0x609   : > { %s2557_s25 = sshll.u32 %s2325_s26, 8  ;;  %p3165_p12 = pneg %p3164_p1 }
 0x60a   : > { %s3898_s7 = scalar_lea.hbm %s4035_s24, %s2557_s25  ;;  %s3309_s23 = smov [#allocation20]  }
 0x60b   : > { %s3166_s19 = sshll.u32 %s3309_s23, 4  ;;  %s3167_s19 = int_to_ptr.vmem [resolvable:$false] %s3166_s19 }
 0x60c   : > { %s3168_s18 = scalar_lea.vmem %s3167_s19, 512  ;;  %p3169_p5 = scmp.lt.s32.totalorder %s3893_s17, %s3167_s19 }
 0x60d   : > { %p3170_p2 = scmp.lt.s32.totalorder %s3168_s18, %s3162_s6 }
 0x60f   : > { %p3171_p6 = por %p3170_p2, %p3169_p5 }
 0x611   : > { %p3172_p13 = pnand %p3171_p6, %p3165_p12 }
 0x613   : > { %3175 = shalt.err (!%p3172_p13)
}
 0x614   : > { %s3176_s12 = scalar_lea.hbm %s3898_s7, 256  ;;  %s3180_s10 = scalar_lea.hbm %s4035_s24, 512 }
 0x615   : > { %p3177_p8 = scmp.ne.s32.totalorder %s3898_s7, %s3176_s12  ;;  %p3181_p0 = scmp.lt.s32.totalorder %s3898_s7, %s4035_s24 }
 0x616   : > { %p3182_p9 = scmp.lt.s32.totalorder %s3180_s10, %s3176_s12 }
 0x617   : > { %p3178_p11 = pnand %p3177_p8, %p3428_p7 }
 0x618   : > { %p3183_p10 = por %p3182_p9, %p3181_p0 }
 0x619   : > { %p3179_p4 = pneg %p3178_p11 }
 0x61b   : > { %p3184_p3 = pnand %p3183_p10, %p3179_p4 }
 0x61d   : > { %3187 = shalt.err (!%p3184_p3)
}
 0x61e   : > { %2816 = dma.vmem_to_hbm [thread:$0]  (%p3428_p7), %s3893_s17, 256, %s3898_s7, %s2305_s22, %s3307_s11, %s3307_s11, %s3308_s14  }
 0x61f   : > { %p4036_p1 = scmp.eq.s32.totalorder %s3409_s16, 3 }
 0x621   : > { %3245 = dma.done.wait (%p4036_p1), [#allocation12], 2048   ;;  %p4037_p12 = pmov %p4036_p1 }
 0x623   : > { %3247 = vsyncadd (%p4037_p12), [#allocation12], 4294965248 }
 0x624 PF: > { %s4038_s26 = sld [smem:[#allocation27_spill]]  ;;  %p2850_p5 = scmp.ge.s32.totalorder %s3294_s15, 2 }
 0x625   : > { %s4039_s25 = sld [smem:[#allocation33_spill]] }
 0x62a   : > { %s2351_s30 = sand.u32 1, %s4038_s26  }
 0x62b   : > { %p4040_p2 = scmp.ne.s32.totalorder %s4039_s25, 0  ;;  %s2352_s4 = scalar_lea.sflag [#allocation21], %s2351_s30 }
 0x62d   : > { %p2838_p6 = pnand %p2850_p5, %p4040_p2 }
 0x62f   : > { %p2839_p13 = pneg %p2838_p6 }
 0x631   : > { %3249 = dma.done.wait (%p2839_p13), %s2352_s4, 256  }
 0x632   : > { %3251 = vsyncadd (%p2839_p13), %s2352_s4, 4294967040  ;;  %s28_s15 = sadd.s32 1, %s3294_s15   ;;  %s4041_s16 = sld [smem:[#allocation28_spill]] }
 0x633   : > { %p25_p7 = scmp.ge.s32.totalorder %s28_s15, 6   ;;  %s4042_s10 = sld [smem:[#allocation36_spill]] }
 0x634   : > { %s4043_s12 = sld [smem:[#allocation31_spill]]  ;;  %s4046_s27 = smov %s3258_s28 }
 0x635   : > { %s4044_s14 = sld [smem:[#allocation34_spill]]  ;;  %s4047_s28 = smov %s3262_s29 }
 0x636   : > { %s4045_s17 = sld [smem:[#allocation35_spill]]  ;;  %s4048_s29 = smov %s3491_s8 }
 0x637   : > { %s4049_s30 = smov %s3270_s9  ;;  %s4051_s11 = smov %s3286_s13 }
 0x638   : > { %s4050_s9 = smov %s4041_s16  ;;  %27 = sbr.rel (!%p25_p7) target bundleno = 19 (0x13), region = 148 }
 0x63b   : > { %s4052_s13 = smov %s4044_s14 }
 0x63c   : > { %s4053_s14 = smov %s4045_s17 }
 0x63d   :  { %2357 = vsyncpa [#allocation11], 1 }
 0x63e   :  { %2359 = vsyncpa [#allocation11 + $0x1], 1 }
 0x63f   :  { %2360 = vsyncpa [#allocation14], 1 }
 0x640   :  { %2362 = vsyncpa [#allocation14 + $0x1], 1 }
 0x641   :  { %2363 = vsyncpa [#allocation17], 1 }
 0x642   :  { %2364 = vsyncpa [#allocation12], 1 }
 0x643   :  { %2366 = vsyncpa [#allocation12 + $0x1], 1 }
 0x644   :  { %2367 = vsyncpa [#allocation21], 1 }
 0x645   :  { %2369 = vsyncpa [#allocation21 + $0x1], 1 }

</bundles_post_ra>
